<compile_context>
chip_gen: v7x
topology: tpu7x:2x2x1
jax: 0.10.0
libtpu: 0.0.40
codegen_flags: <defaults>
</compile_context>

<pallas_src>
import functools

import jax
import jax.numpy as jnp
from jax.experimental import pallas as pl
from jax.experimental.pallas import tpu as pltpu


# ----------------------------------------------------------------------------
# Kernel
# ----------------------------------------------------------------------------
def _mlp_kernel(x_ref, wgu_ref, wd_ref, o_ref, acc_ref):
    """One (token-tile i, intermediate-slice k) step of the SwiGLU MLP."""
    k = pl.program_id(1)

    @pl.when(k == 0)
    def _():
        acc_ref[...] = jnp.zeros_like(acc_ref)

    # Fused gate/up projection: one wide (tm, 2*ti) matmul on the MXU.
    # Operands stay in their native dtype (bf16 in production); accumulate f32.
    gu = jnp.dot(x_ref[...], wgu_ref[...], preferred_element_type=jnp.float32)
    ti = wgu_ref.shape[1] // 2
    gate = gu[:, :ti]          # static, lane-aligned slices (ti % 128 == 0)
    up = gu[:, ti:]

    # SiLU(gate) * up in f32 (sigmoid rides the EUP slot, ~free next to MXU).
    h = gate * jax.nn.sigmoid(gate) * up

    # Partial down-projection for this I-slice, accumulated in f32 VMEM.
    acc_ref[...] += jnp.dot(h.astype(wd_ref.dtype), wd_ref[...],
                            preferred_element_type=jnp.float32)

    @pl.when(k == pl.num_programs(1) - 1)
    def _():
        o_ref[...] = acc_ref[...].astype(o_ref.dtype)


# ----------------------------------------------------------------------------
# Tiling helpers
# ----------------------------------------------------------------------------
def _round_up(a, b):
    return -(-a // b) * b


def _chip_info():
    kind = ""
    try:
        kind = jax.devices()[0].device_kind.lower()
    except Exception:
        pass
    vmem_cap = None
    try:
        vmem_cap = int(pltpu.get_tpu_info().vmem_capacity_bytes)
    except Exception:
        pass
    if vmem_cap is None:
        vmem_cap = (64 if "v7" in kind else 128) * 1024 * 1024
    return kind, vmem_cap


def _tile_bytes(tm, ti, H, x_bytes, w_bytes):
    return (tm * H * x_bytes               # x tile (single-buffered)
            + 2 * H * (2 * ti) * w_bytes   # fused gate/up slice (double-buffered)
            + 2 * ti * H * w_bytes         # down-proj slice (double-buffered)
            + 2 * tm * H * x_bytes         # output tile (double-buffered)
            + tm * H * 4)                  # f32 accumulator scratch


def select_mlp_tiles(H, I, x_itemsize=2, w_itemsize=2):
    """Per-chip (tm, ti) sized against the arithmetic-intensity ridge and the
    per-chip VMEM budget.  ti is needed at weight-pack time."""
    kind, vmem_cap = _chip_info()
    budget = int(0.85 * vmem_cap)
    if "v7" in kind:            # ridge ~310 FLOP/B, 64 MiB VMEM, 2 TCs
        tm, ti = 512, 512
    elif "v6" in kind:          # ridge ~650 FLOP/B, 128 MiB VMEM
        tm, ti = 768, 1024
    else:                       # v5e (ridge ~240 FLOP/B) / unknown
        tm, ti = 256, 512
    while ti > 128 and I % ti != 0:
        ti //= 2
    if I % ti != 0:
        ti = I
    while _tile_bytes(tm, ti, H, x_itemsize, w_itemsize) > budget:
        if ti > 256 and I % (ti // 2) == 0:
            ti //= 2
        elif tm > 64:
            tm //= 2
        else:
            break
    return tm, ti


def pack_gate_up(wg_t, wu_t, ti):
    """Pack gate/up weights as (I//ti, H, 2*ti) so the k-th block
    [gate_k | up_k] is one contiguous HBM stream.  Done once at load time.

    wg_t, wu_t: (H, I) = gate_proj.weight.T / up_proj.weight.T.
    """
    H, I = wg_t.shape
    assert wu_t.shape == (H, I) and I % ti == 0
    nk = I // ti
    blk = jnp.concatenate([wg_t.reshape(H, nk, ti), wu_t.reshape(H, nk, ti)],
                          axis=2)                    # (H, nk, 2*ti)
    return jnp.transpose(blk, (1, 0, 2))             # (nk, H, 2*ti)


def _x_block_spec(tm, H):
    idx = lambda i, k: (i, 0)
    try:
        # The x block only changes once per I//ti inner steps: single-buffer it
        # to reclaim tm*H*itemsize of VMEM (matters most on v7x's 64 MiB).
        return pl.BlockSpec((tm, H), idx, pipeline_mode=pl.Buffered(1))
    except TypeError:  # older jax without pipeline_mode
        return pl.BlockSpec((tm, H), idx)


# ----------------------------------------------------------------------------
# pallas_call wrapper
# ----------------------------------------------------------------------------
@functools.partial(jax.jit, static_argnames=("tm", "vmem_limit"))
def _llama_mlp_impl(x, wgu_t, wd_t, *, tm, vmem_limit):
    T, H = x.shape
    nk, _, two_ti = wgu_t.shape
    ti = two_ti // 2
    I = nk * ti

    T_pad = _round_up(T, tm)
    xp = x if T_pad == T else jnp.pad(x, ((0, T_pad - T), (0, 0)))
    n_token_tiles = T_pad // tm

    x_itemsize = jnp.dtype(x.dtype).itemsize
    w_itemsize = jnp.dtype(wgu_t.dtype).itemsize
    cost = pl.CostEstimate(
        flops=6 * T_pad * H * I,           # 2*T*H*2I (gate/up) + 2*T*I*H (down)
        transcendentals=T_pad * I,         # sigmoid
        # Weights are re-streamed once per token tile; x and out each once.
        bytes_accessed=int((xp.size + T_pad * H) * x_itemsize
                           + n_token_tiles * (wgu_t.size + wd_t.size) * w_itemsize),
    )

    out = pl.pallas_call(
        _mlp_kernel,
        out_shape=jax.ShapeDtypeStruct((T_pad, H), x.dtype),
        grid_spec=pltpu.PrefetchScalarGridSpec(
            num_scalar_prefetch=0,
            grid=(n_token_tiles, nk),
            in_specs=[
                _x_block_spec(tm, H),                                      # token tile
                pl.BlockSpec((None, H, two_ti), lambda i, k: (k, 0, 0)),   # [gate|up]_k
                pl.BlockSpec((ti, H), lambda i, k: (k, 0)),                # down slice
            ],
            out_specs=pl.BlockSpec((tm, H), lambda i, k: (i, 0)),
            scratch_shapes=[pltpu.VMEM((tm, H), jnp.float32)],
        ),
        compiler_params=pltpu.CompilerParams(
            dimension_semantics=("parallel", "arbitrary"),
            vmem_limit_bytes=vmem_limit,
        ),
        cost_estimate=cost,
    )(xp, wgu_t, wd_t)
    return out if T_pad == T else out[:T]


def llama_mlp(x, wgu_t, wd_t, *, tm=None):
    """x: (T, H); wgu_t: (I//ti, H, 2*ti) from pack_gate_up; wd_t: (I, H)."""
    T, H = x.shape
    nk, Hw, two_ti = wgu_t.shape
    ti = two_ti // 2
    I = nk * ti
    assert Hw == H and wd_t.shape == (I, H)
    assert H % 128 == 0
    assert ti % 128 == 0 or ti == I

    kind, vmem_cap = _chip_info()
    budget = int(0.85 * vmem_cap)      # headroom for Mosaic scratch / semaphores
    x_itemsize = jnp.dtype(x.dtype).itemsize
    w_itemsize = jnp.dtype(wgu_t.dtype).itemsize

    if tm is None:
        tm = 512 if "v7" in kind else (768 if "v6" in kind else 256)
        while _tile_bytes(tm, ti, H, x_itemsize, w_itemsize) > budget and tm > 64:
            tm //= 2
        tm = min(tm, _round_up(T, 8))
        # v7x has 2 TensorCores: keep >= 2 blocks on the "parallel" token axis.
        if "v7" in kind and T > 128 and -(-T // tm) < 2:
            tm = max(64, _round_up(-(-T // 2), 8))
    assert tm % 8 == 0

    tile_bytes = _tile_bytes(tm, ti, H, x_itemsize, w_itemsize)
    vmem_limit = int(min(max(int(tile_bytes * 1.25), 32 * 1024 * 1024), budget))

    return _llama_mlp_impl(x, wgu_t, wd_t, tm=tm, vmem_limit=vmem_limit)


# ----------------------------------------------------------------------------
# Reference + demo
# ----------------------------------------------------------------------------
def reference_mlp(x, wg, wu, wd):
    """Pure-JAX (f32) reference mirroring the PyTorch LlamaMLP forward."""
    xf = x.astype(jnp.float32)
    gate = xf @ wg.astype(jnp.float32).T
    up = xf @ wu.astype(jnp.float32).T
    return (gate * jax.nn.sigmoid(gate) * up) @ wd.astype(jnp.float32).T


if __name__ == "__main__":
    key = jax.random.PRNGKey(0)
    # Small but representative: 200 tokens (ragged vs tile), H=256, I=512.
    T, H, I = 200, 256, 512

    k1, k2, k3, k4 = jax.random.split(key, 4)
    x = jax.random.normal(k1, (T, H), dtype=jnp.float32)
    w_gate = jax.random.normal(k2, (I, H), dtype=jnp.float32) * 0.05
    w_up = jax.random.normal(k3, (I, H), dtype=jnp.float32) * 0.05
    w_down = jax.random.normal(k4, (H, I), dtype=jnp.float32) * 0.05

    ref = reference_mlp(x, w_gate, w_up, w_down)

    # --- f32, explicit small tiles: exercises the 2-D grid, the K-axis
    #     accumulator, and the ragged-T padding path --------------------------
    ti32 = 256
    wgu32 = pack_gate_up(w_gate.T, w_up.T, ti32)
    out32 = jax.block_until_ready(llama_mlp(x, wgu32, w_down.T, tm=128))
    assert out32.shape == (T, H)
    assert jnp.allclose(out32, ref, atol=3e-2, rtol=3e-2), "f32 mismatch"

    # --- bf16, per-chip auto tiles (production path) -------------------------
    xb = x.astype(jnp.bfloat16)
    wgb, wub, wdb = (w.astype(jnp.bfloat16) for w in (w_gate, w_up, w_down))
    _, ti_b = select_mlp_tiles(H, I, xb.dtype.itemsize, wgb.dtype.itemsize)
    wgu_b = pack_gate_up(wgb.T, wub.T, ti_b)
    outb = jax.block_until_ready(llama_mlp(xb, wgu_b, wdb.T))
    refb = reference_mlp(xb, wgb, wub, wdb)
    assert outb.shape == (T, H)
    assert jnp.allclose(outb.astype(jnp.float32), refb, atol=5e-2, rtol=5e-2), \
        "bf16 mismatch"

    print("KERNEL_OK")
</pallas_src>

<mosaic_0001>
module attributes {stable_mosaic.version = 11 : i64} {
  func.func @_mlp_kernel(%arg0: i32, %arg1: i32, %arg2: memref<128x256xf32, #tpu.memory_space<vmem>>, %arg3: memref<1x256x512xf32, #tpu.memory_space<vmem>>, %arg4: memref<256x256xf32, #tpu.memory_space<vmem>>, %arg5: memref<128x256xf32, #tpu.memory_space<vmem>>, %arg6: memref<128x256xf32, #tpu.memory_space<vmem>>) attributes {dimension_semantics = [#tpu.dimension_semantics<parallel>, #tpu.dimension_semantics<arbitrary>], iteration_bounds = array<i64: 2, 2>, scalar_prefetch = 0 : i64, scratch_operands = 1 : i64, tpu.core_type = #tpu.core_type<tc>, window_params = [{pipeline_mode = #tpu.pipeline_mode<synchronous>, transform_indices = @transform_0, window_bounds = array<i64: 128, 256>}, {transform_indices = @transform_1, window_bounds = array<i64: 1, 256, 512>}, {transform_indices = @transform_2, window_bounds = array<i64: 256, 256>}, {transform_indices = @transform_3, window_bounds = array<i64: 128, 256>}]} {
    %c0_i32 = arith.constant 0 : i32
    %0 = arith.cmpi eq, %arg1, %c0_i32 : i32
    %1 = arith.extui %0 : i1 to i32
    %c0_i32_0 = arith.constant 0 : i32
    %2 = arith.cmpi ne, %1, %c0_i32_0 : i32
    scf.if %2 {
      %cst_14 = arith.constant 0.000000e+00 : f32
      %24 = vector.broadcast %cst_14 : f32 to vector<128x256xf32>
      %c0_15 = arith.constant 0 : index
      %c0_16 = arith.constant 0 : index
      %25 = vector.load %arg6[%c0_15, %c0_16] : memref<128x256xf32, #tpu.memory_space<vmem>>, vector<128x256xf32>
      tpu.vector_store %arg6[%c0_15, %c0_16], %24 {strides = array<i32>} : memref<128x256xf32, #tpu.memory_space<vmem>>, vector<128x256xf32>,
    } else {
    }
    %c0 = arith.constant 0 : index
    %c0_1 = arith.constant 0 : index
    %3 = vector.load %arg2[%c0, %c0_1] : memref<128x256xf32, #tpu.memory_space<vmem>>, vector<128x256xf32>
    %c0_2 = arith.constant 0 : index
    %c0_3 = arith.constant 0 : index
    %c0_4 = arith.constant 0 : index
    %4 = vector.load %arg3[%c0_2, %c0_3, %c0_4] : memref<1x256x512xf32, #tpu.memory_space<vmem>>, vector<1x256x512xf32>
    %5 = vector.shape_cast %4 : vector<1x256x512xf32> to vector<256x512xf32>
    %cst = arith.constant dense<0.000000e+00> : vector<128x512xf32>
    %6 = tpu.matmul %3, %5, %cst {dimension_numbers = #tpu.dot_dimension_numbers<[1], [0], [0], [1], [0, 0, 1, 1], [], []>} : vector<128x256xf32>, vector<256x512xf32>, vector<128x512xf32> -> vector<128x512xf32>
    %7 = vector.extract_strided_slice %6 {offsets = [0, 0], sizes = [128, 256], strides = [1, 1]} : vector<128x512xf32> to vector<128x256xf32>
    %8 = vector.extract_strided_slice %6 {offsets = [0, 256], sizes = [128, 256], strides = [1, 1]} : vector<128x512xf32> to vector<128x256xf32>
    %9 = arith.negf %7 : vector<128x256xf32>
    %10 = math.exp %9 : vector<128x256xf32>
    %cst_5 = arith.constant 1.000000e+00 : f32
    %11 = vector.broadcast %cst_5 : f32 to vector<128x256xf32>
    %12 = arith.addf %11, %10 : vector<128x256xf32>
    %13 = arith.divf %11, %12 : vector<128x256xf32>
    %14 = arith.mulf %7, %13 : vector<128x256xf32>
    %15 = arith.mulf %14, %8 : vector<128x256xf32>
    %c0_6 = arith.constant 0 : index
    %c0_7 = arith.constant 0 : index
    %16 = vector.load %arg6[%c0_6, %c0_7] : memref<128x256xf32, #tpu.memory_space<vmem>>, vector<128x256xf32>
    %c0_8 = arith.constant 0 : index
    %c0_9 = arith.constant 0 : index
    %17 = vector.load %arg4[%c0_8, %c0_9] : memref<256x256xf32, #tpu.memory_space<vmem>>, vector<256x256xf32>
    %cst_10 = arith.constant dense<0.000000e+00> : vector<128x256xf32>
    %18 = tpu.matmul %15, %17, %cst_10 {dimension_numbers = #tpu.dot_dimension_numbers<[1], [0], [0], [1], [0, 0, 1, 1], [], []>} : vector<128x256xf32>, vector<256x256xf32>, vector<128x256xf32> -> vector<128x256xf32>
    %19 = arith.addf %16, %18 : vector<128x256xf32>
    %c0_11 = arith.constant 0 : index
    %c0_12 = arith.constant 0 : index
    %20 = vector.load %arg6[%c0_11, %c0_12] : memref<128x256xf32, #tpu.memory_space<vmem>>, vector<128x256xf32>
    tpu.vector_store %arg6[%c0_11, %c0_12], %19 {strides = array<i32>} : memref<128x256xf32, #tpu.memory_space<vmem>>, vector<128x256xf32>,
    %c1_i32 = arith.constant 1 : i32
    %21 = arith.cmpi eq, %arg1, %c1_i32 : i32
    %22 = arith.extui %21 : i1 to i32
    %c0_i32_13 = arith.constant 0 : i32
    %23 = arith.cmpi ne, %22, %c0_i32_13 : i32
    scf.if %23 {
      %c0_14 = arith.constant 0 : index
      %c0_15 = arith.constant 0 : index
      %24 = vector.load %arg6[%c0_14, %c0_15] : memref<128x256xf32, #tpu.memory_space<vmem>>, vector<128x256xf32>
      %c0_16 = arith.constant 0 : index
      %c0_17 = arith.constant 0 : index
      %25 = vector.load %arg5[%c0_16, %c0_17] : memref<128x256xf32, #tpu.memory_space<vmem>>, vector<128x256xf32>
      tpu.vector_store %arg5[%c0_16, %c0_17], %24 {strides = array<i32>} : memref<128x256xf32, #tpu.memory_space<vmem>>, vector<128x256xf32>,
    } else {
    }
    return
  }
  func.func @transform_0(%arg0: i32, %arg1: i32) -> (i32, i32) {
    %c0_i32 = arith.constant 0 : i32
    %c0_i32_0 = arith.constant 0 : i32
    return %arg0, %c0_i32 : i32, i32
  }
  func.func @transform_1(%arg0: i32, %arg1: i32) -> (i32, i32, i32) {
    %c0_i32 = arith.constant 0 : i32
    %c0_i32_0 = arith.constant 0 : i32
    %c0_i32_1 = arith.constant 0 : i32
    return %arg1, %c0_i32, %c0_i32_0 : i32, i32, i32
  }
  func.func @transform_2(%arg0: i32, %arg1: i32) -> (i32, i32) {
    %c0_i32 = arith.constant 0 : i32
    %c0_i32_0 = arith.constant 0 : i32
    return %arg1, %c0_i32 : i32, i32
  }
  func.func @transform_3(%arg0: i32, %arg1: i32) -> (i32, i32) {
    %c0_i32 = arith.constant 0 : i32
    %c0_i32_0 = arith.constant 0 : i32
    return %arg0, %c0_i32 : i32, i32
  }
}

</mosaic_0001>

<bundles_post_ra>
// kernel: _llama_mlp_impl.1
= control target key start
LH: loop header
LB: loop body
LE: loop exit
PB: predicated region body
PF: predicated region fallthrough
CT: control target
= control target key end

     0   :  { %8 = vsyncpa [#allocation4], 0  ;;  %s2880_s0 = inlined_call_operand.vmem [shape: f32[256,256], index: 0, kind: input, shape index: {}]   ;;  %s2881_s1 = inlined_call_operand.hbm [shape: f32[2,256,512], index: 1, kind: input, shape index: {}]   ;;  %s2882_s2 = inlined_call_operand.hbm [shape: f32[512,256], index: 2, kind: input, shape index: {}]   ;;  %s2883_s3 = inlined_call_operand.vmem [shape: f32[256,256], index: 3, kind: output, shape index: {}]  }
   0x1   :  { %10 = vsyncpa [#allocation4 + $0x1], 0 }
   0x2   :  { %11 = vsyncpa [#allocation6], 0 }
   0x3   :  { %13 = vsyncpa [#allocation6 + $0x1], 0  ;;  %s2208_s12 = smov 0   ;;  %s2210_s13 = smov 0  }
   0x4   :  { %s2212_s14 = smov 0   ;;  %s2214_s15 = smov 0  }
   0x5   :  { %s2216_s16 = smov 0   ;;  %s2218_s17 = smov 0  }
   0x6   :  { %s2220_s18 = smov 0   ;;  %s2222_s19 = smov 0  }
   0x7 LB: > { %s1555_s20 = sadd.s32 4294967295, %s2179_s19   ;;  %s28_s21 = sadd.s32 1, %s2171_s17  ;;  %s2179_s19 = sphi %s2222_s19, %s19_s19   ;;  %s2175_s18 = sphi %s2220_s18, %s2896_s18   ;;  %s2171_s17 = sphi %s2218_s17, %s2895_s17   ;;  %s2167_s16 = sphi %s2216_s16, %s2894_s16   ;;  %s2163_s15 = sphi %s2214_s15, %s2893_s15   ;;  %s2159_s14 = sphi %s2212_s14, %s2892_s14   ;;  %s2155_s13 = sphi %s2210_s13, %s2891_s13   ;;  %s2151_s12 = sphi %s2208_s12, %s2890_s12  }
   0x8   : > { %p29_p0 = scmp.ge.s32.totalorder %s28_s21, 2  ;;  %s31_s22 = sadd.s32 1, %s2175_s18 }
   0x9   : > { %s64_s23 = sadd.s32 1, %s2159_s14  ;;  %p71_p1 = scmp.ne.s32.totalorder %s2159_s14, %s2155_s13 }
   0xa   : > { %s2898_s21 = smov (%p29_p0, %s28_s21), 0  ;;  %s2900_s22 = smov (!%p29_p0, %s31_s22), %s2175_s18 }
   0xb   : > { %s61_s24 = ssub.s32 %s2171_s17, %s2898_s21  ;;  %p72_p2 = scmp.eq.s32.totalorder %s2179_s19, 0 }
   0xc   : > { %p33_p3 = scmp.ge.s32.totalorder %s2900_s22, 2  ;;  %p62_p4 = scmp.eq.s32.totalorder %s61_s24, 0 }
   0xd   : > { %p2258_p5 = por %p72_p2, %p71_p1  ;;  %p77_p6 = scmp.ne.s32.totalorder %s2155_s13, %s2151_s12 }
   0xe   : > { %s2902_s22 = smov (%p33_p3, %s2900_s22), 0  ;;  %p78_p7 = scmp.eq.s32.totalorder %s1555_s20, 0 }
   0xf   : > { %s2266_s26 = scalar_select %p62_p4, %s2159_s14, %s64_s23  }
  0x10   : > { %p1851_p8 = scmp.lt.s32.totalorder %s2179_s19, 4  ;;  %s2270_s27 = sand.u32 1, %s2159_s14  }
  0x11   : > { %p2272_p9 = por %p78_p7, %p77_p6  ;;  %s1559_s29 = sshll.u32 %s2270_s27, 10 }
  0x12   : > { %s1611_s30 = sshll.u32 %s2171_s17, 14  ;;  %s167_s7 = scalar_lea.vmem [#allocation3], %s1559_s29 }
  0x13   : > { %s2886_s28 = scalar_select %p2272_p9, 1, 0 }
  0x14   : > { %s2281_s6 = scalar_lea.hbm %s2881_s1, %s1611_s30  ;;  %s174_s8 = sshll.u32 %s167_s7, 4  ;;  %s2289_s8 = int_to_ptr.vmem [resolvable:$true] %s174_s8 }
  0x15   : > { %p2285_p10 = pnand %p1851_p8, %p2258_p5  ;;  %s164_s10 = scalar_lea.sflag [#allocation4], %s2270_s27 }
  0x16   : > { %s2049_s11 = scalar_lea.hbm %s2281_s6, 16384  ;;  %s2054_s23 = scalar_lea.hbm %s2881_s1, 32768 }
  0x17   : > { %p2050_p11 = scmp.ne.s32.totalorder %s2281_s6, %s2049_s11  ;;  %p2051_p12 = pneg %p2285_p10 }
  0x18   : > { %p2055_p1 = scmp.lt.u32.totalorder %s2281_s6, %s2881_s1  ;;  %p2056_p2 = scmp.lt.u32.totalorder %s2054_s23, %s2049_s11 }
  0x19   : > { %p2052_p13 = pnand %p2051_p12, %p2050_p11  ;;  %p2058_p4 = scmp.lt.u32.totalorder %s2049_s11, %s2281_s6 }
  0x1a   : > { %p2057_p3 = por %p2056_p2, %p2055_p1 }
  0x1b   : > { %p2053_p0 = pneg %p2052_p13 }
  0x1c   : > { %p2059_p5 = por %p2058_p4, %p2057_p3 }
  0x1e   : > { %p2060_p6 = pnand %p2059_p5, %p2053_p0 }
  0x20   : > { %2063 = shalt.err (!%p2060_p6)
}
  0x21   : > { %s2064_s29 = scalar_lea.vmem %s2289_s8, 16384  ;;  %s2181_s30 = smov [#allocation3]  }
  0x22   : > { %p2065_p7 = scmp.ne.s32.totalorder %s2289_s8, %s2064_s29  ;;  %s2069_s4 = sshll.u32 %s2181_s30, 4  ;;  %s2070_s4 = int_to_ptr.vmem [resolvable:$false] %s2069_s4 }
  0x23   : > { %s2071_s5 = scalar_lea.vmem %s2070_s4, 32768  ;;  %p2072_p13 = scmp.lt.s32.totalorder %s2289_s8, %s2070_s4 }
  0x24   : > { %p2067_p8 = pnand %p2065_p7, %p2051_p12  ;;  %p2073_p1 = scmp.lt.s32.totalorder %s2071_s5, %s2064_s29 }
  0x26   : > { %p2068_p11 = pneg %p2067_p8  ;;  %p2074_p2 = por %p2073_p1, %p2072_p13 }
  0x28   : > { %p2075_p3 = pnand %p2074_p2, %p2068_p11 }
  0x2a   : > { %2078 = shalt.err (!%p2075_p3)
}
  0x2b   : > { %s2182_s7 = smov 512   ;;  %s2183_s11 = smov 32  }
  0x2c   : > { %1847 = dma.hbm_to_vmem [thread:$0]  (!%p2285_p10), %s2281_s6, 16384, %s2289_s8, %s164_s10, %s2182_s7, %s2182_s7, %s2183_s11  }
  0x2d   : > { %p1566_p0 = scmp.ge.s32.totalorder %s2179_s19, 1  ;;  %p204_p4 = scmp.lt.s32.totalorder %s2179_s19, 5 }
  0x2e   : > { %s1562_s12 = sshll.u32 %s2270_s27, 9  ;;  %s1613_s23 = sshll.u32 %s2171_s17, 13 }
  0x2f   : > { %p2322_p5 = pnand %p1566_p0, %p204_p4  ;;  %s188_s24 = scalar_lea.vmem [#allocation5], %s1562_s12 }
  0x30   : > { %s196_s25 = sshll.u32 %s188_s24, 4  ;;  %s2330_s4 = scalar_lea.hbm %s2882_s2, %s1613_s23  ;;  %s2332_s25 = int_to_ptr.vmem [resolvable:$true] %s196_s25 }
  0x31   : > { %s185_s6 = scalar_lea.sflag [#allocation6], %s2270_s27  ;;  %s2079_s8 = scalar_lea.hbm %s2330_s4, 8192 }
  0x32   : > { %p2080_p6 = scmp.ne.s32.totalorder %s2330_s4, %s2079_s8  ;;  %s2084_s7 = scalar_lea.hbm %s2882_s2, 16384 }
  0x33   : > { %p2085_p11 = scmp.lt.u32.totalorder %s2330_s4, %s2882_s2  ;;  %p2086_p13 = scmp.lt.u32.totalorder %s2084_s7, %s2079_s8 }
  0x34   : > { %p2082_p7 = pnand %p2080_p6, %p2051_p12  ;;  %p2088_p2 = scmp.lt.u32.totalorder %s2079_s8, %s2330_s4 }
  0x35   : > { %p2087_p1 = por %p2086_p13, %p2085_p11 }
  0x36   : > { %p2083_p8 = pneg %p2082_p7 }
  0x37   : > { %p2089_p3 = por %p2088_p2, %p2087_p1 }
  0x39   : > { %p2090_p0 = pnand %p2089_p3, %p2083_p8 }
  0x3b   : > { %2093 = shalt.err (!%p2090_p0)
}
  0x3c   : > { %s2094_s23 = scalar_lea.vmem %s2332_s25, 8192  ;;  %s2184_s24 = smov [#allocation5]  }
  0x3d   : > { %p2095_p4 = scmp.ne.s32.totalorder %s2332_s25, %s2094_s23  ;;  %s2099_s29 = sshll.u32 %s2184_s24, 4  ;;  %s2100_s29 = int_to_ptr.vmem [resolvable:$false] %s2099_s29 }
  0x3e   : > { %s2101_s30 = scalar_lea.vmem %s2100_s29, 16384  ;;  %p2102_p9 = scmp.lt.s32.totalorder %s2332_s25, %s2100_s29 }
  0x3f   : > { %p2097_p6 = pnand %p2095_p4, %p2051_p12  ;;  %p2103_p11 = scmp.lt.s32.totalorder %s2101_s30, %s2094_s23 }
  0x41   : > { %p2098_p7 = pneg %p2097_p6  ;;  %p2104_p13 = por %p2103_p11, %p2102_p9 }
  0x43   : > { %p2105_p1 = pnand %p2104_p13, %p2098_p7 }
  0x45   : > { %2108 = shalt.err (!%p2105_p1)
}
  0x46   : > { %s2185_s8 = smov 256   ;;  %s2186_s10 = smov 16  }
  0x47   : > { %1850 = dma.hbm_to_vmem [thread:$0]  (!%p2285_p10), %s2330_s4, 8192, %s2332_s25, %s185_s6, %s2185_s8, %s2185_s8, %s2186_s10  }
  0x48   : > { %208 = sbr.rel (%p2322_p5) target bundleno = 700 (0x2bc), region = 32  ;;  %s210_s5 = sand.u32 (!%p2322_p5), 1, %s2155_s13  }
  0x49   : > { %s1567_s7 = sshll.u32 (!%p2322_p5), %s210_s5, 10  ;;  %s211_s11 = scalar_lea.sflag (!%p2322_p5), [#allocation4], %s210_s5 }
  0x4a   : > { %s2363_s12 = scalar_lea.vmem (!%p2322_p5), [#allocation3], %s1567_s7  ;;  %p2889_p9 = scmp.ne.s32.totalorder (!%p2322_p5), %s2886_s28, 0 }
  0x4f   : > { %2142 = dma.done.wait (%p2889_p9), %s211_s11, 16384  }
  0x50   : > { %2144 = vsyncadd (%p2889_p9), %s211_s11, 4294950912  ;;  %s1568_s23 = sshll.u32 %s210_s5, 9  ;;  %s220_s9 = scalar_lea.sflag [#allocation6], %s210_s5 }
  0x51   : > { %s2369_s27 = scalar_lea.vmem [#allocation5], %s1568_s23 }
  0x52   : > { %2146 = dma.done.wait (%p2889_p9), %s220_s9, 8192  }
  0x53   : > { %2148 = vsyncadd (%p2889_p9), %s220_s9, 4294959104  ;;  %s1569_s20 = sshll.u32 %s2167_s16, 4  ;;  %p1575_p12 = scmp.ne.s32.totalorder %s2163_s15, 0 }
  0x54   : > { %p259_p10 = scmp.lt.s32.totalorder %s1569_s20, 31  ;;  %v2187_v0 = vmov (!%p1575_p12), 0.0  }
  0x55   : > { %276 = sbr.rel (%p1575_p12) target bundleno = 101 (0x65), region = 44  ;;  %277 = vst [vmem:[#allocation2] sm:$0xff] (!%p1575_p12), %v2187_v0  ;;  %278 = vst [vmem:[#allocation2 + $0x8] sm:$0xff] (!%p1575_p12), %v2187_v0 }
  0x56   : > { %s2904_s20 = smov (!%p259_p10, %s1569_s20), 31  ;;  %279 = vst [vmem:[#allocation2 + $0x10] sm:$0xff] (!%p1575_p12), %v2187_v0  ;;  %280 = vst [vmem:[#allocation2 + $0x18] sm:$0xff] (!%p1575_p12), %v2187_v0 }
  0x57   : > { %s1614_s25 = sshll.u32 %s2904_s20, 4  ;;  %281 = vst [vmem:[#allocation2 + $0x20] sm:$0xff] (!%p1575_p12), %v2187_v0  ;;  %282 = vst [vmem:[#allocation2 + $0x28] sm:$0xff] (!%p1575_p12), %v2187_v0 }
  0x58   : > { %s2379_s24 = scalar_lea.vmem %s2880_s0, %s1614_s25  ;;  %s2384_s8 = scalar_lea.vmem %s2883_s3, %s1614_s25  ;;  %283 = vst [vmem:[#allocation2 + $0x30] sm:$0xff] (!%p1575_p12), %v2187_v0  ;;  %284 = vst [vmem:[#allocation2 + $0x38] sm:$0xff] (!%p1575_p12), %v2187_v0 }
  0x59   : > { %285 = vst [vmem:[#allocation2 + $0x40] sm:$0xff] (!%p1575_p12), %v2187_v0  ;;  %286 = vst [vmem:[#allocation2 + $0x48] sm:$0xff] (!%p1575_p12), %v2187_v0 }
  0x5a   : > { %287 = vst [vmem:[#allocation2 + $0x50] sm:$0xff] (!%p1575_p12), %v2187_v0  ;;  %288 = vst [vmem:[#allocation2 + $0x58] sm:$0xff] (!%p1575_p12), %v2187_v0 }
  0x5b   : > { %289 = vst [vmem:[#allocation2 + $0x60] sm:$0xff] (!%p1575_p12), %v2187_v0  ;;  %290 = vst [vmem:[#allocation2 + $0x68] sm:$0xff] (!%p1575_p12), %v2187_v0 }
  0x5c   : > { %291 = vst [vmem:[#allocation2 + $0x70] sm:$0xff] %v2187_v0  ;;  %292 = vst [vmem:[#allocation2 + $0x78] sm:$0xff] %v2187_v0 }
  0x5d   : > { %293 = vst [vmem:[#allocation2 + $0x80] sm:$0xff] %v2187_v0  ;;  %294 = vst [vmem:[#allocation2 + $0x88] sm:$0xff] %v2187_v0 }
  0x5e   : > { %295 = vst [vmem:[#allocation2 + $0x90] sm:$0xff] %v2187_v0  ;;  %296 = vst [vmem:[#allocation2 + $0x98] sm:$0xff] %v2187_v0 }
  0x5f   : > { %297 = vst [vmem:[#allocation2 + $0xa0] sm:$0xff] %v2187_v0  ;;  %298 = vst [vmem:[#allocation2 + $0xa8] sm:$0xff] %v2187_v0 }
  0x60   : > { %299 = vst [vmem:[#allocation2 + $0xb0] sm:$0xff] %v2187_v0  ;;  %300 = vst [vmem:[#allocation2 + $0xb8] sm:$0xff] %v2187_v0 }
  0x61   : > { %301 = vst [vmem:[#allocation2 + $0xc0] sm:$0xff] %v2187_v0  ;;  %302 = vst [vmem:[#allocation2 + $0xc8] sm:$0xff] %v2187_v0 }
  0x62   : > { %303 = vst [vmem:[#allocation2 + $0xd0] sm:$0xff] %v2187_v0  ;;  %304 = vst [vmem:[#allocation2 + $0xd8] sm:$0xff] %v2187_v0 }
  0x63   : > { %305 = vst [vmem:[#allocation2 + $0xe0] sm:$0xff] %v2187_v0  ;;  %306 = vst [vmem:[#allocation2 + $0xe8] sm:$0xff] %v2187_v0 }
  0x64   : > { %307 = vst [vmem:[#allocation2 + $0xf0] sm:$0xff] %v2187_v0  ;;  %308 = vst [vmem:[#allocation2 + $0xf8] sm:$0xff] %v2187_v0 }
  0x65 PF: > { %v342_v1 = vld [vmem:[%s2363_s12 + $0x8] sm:$0xff]  ;;  %v341_v3 = vld [vmem:[%s2363_s12] sm:$0xff]  ;;  %v344_v24 = vld [vmem:[%s2363_s12 + $0x18] sm:$0xff]  ;;  %p1608_p5 = scmp.ne.s32.totalorder %s2163_s15, 1 }
  0x66   : > { %v346_v2 = vld [vmem:[%s2363_s12 + $0x28] sm:$0xff]  ;;  %v345_v5 = vld [vmem:[%s2363_s12 + $0x20] sm:$0xff]  ;;  %v348_v25 = vld [vmem:[%s2363_s12 + $0x38] sm:$0xff] }
  0x67   : > { %v1616_v4 = vpack.c.bf16 %v346_v2, %v342_v1  ;;  %v350_v6 = vld [vmem:[%s2363_s12 + $0x48] sm:$0xff]  ;;  %v1618_v8 = vpack.c.bf16 %v345_v5, %v341_v3  ;;  %v349_v10 = vld [vmem:[%s2363_s12 + $0x40] sm:$0xff]  ;;  %v1680_v28 = vpack.c.bf16 %v348_v25, %v344_v24  ;;  %v343_v29 = vld [vmem:[%s2363_s12 + $0x10] sm:$0xff] }
  0x68   : > { %v354_v7 = vld [vmem:[%s2363_s12 + $0x68] sm:$0xff]  ;;  %v353_v11 = vld [vmem:[%s2363_s12 + $0x60] sm:$0xff]  ;;  %v347_v30 = vld [vmem:[%s2363_s12 + $0x30] sm:$0xff] }
  0x69   : > { %v1620_v9 = vpack.c.bf16 %v354_v7, %v350_v6  ;;  %v358_v12 = vld [vmem:[%s2363_s12 + $0x88] sm:$0xff]  ;;  %1617 = vmatprep.subr.bf16.mxu0 %v1616_v4  ;;  %v1622_v14 = vpack.c.bf16 %v353_v11, %v349_v10  ;;  %v357_v16 = vld [vmem:[%s2363_s12 + $0x80] sm:$0xff]  ;;  %1681 = vmatprep.subr.bf16.mxu1 %v1680_v28  ;;  %v1682_v33 = vpack.c.bf16 %v347_v30, %v343_v29  ;;  %v352_v34 = vld [vmem:[%s2363_s12 + $0x58] sm:$0xff] }
  0x6a   : > { %v362_v13 = vld [vmem:[%s2363_s12 + $0xa8] sm:$0xff]  ;;  %1619 = vmatpush1.bf16.msra.mxu0 %v1618_v8  ;;  %v361_v17 = vld [vmem:[%s2363_s12 + $0xa0] sm:$0xff]  ;;  %v356_v35 = vld [vmem:[%s2363_s12 + $0x78] sm:$0xff] }
  0x6b   : > { %1621 = vmatprep.subr.bf16.mxu0 %v1620_v9  ;;  %v1624_v15 = vpack.c.bf16 %v362_v13, %v358_v12  ;;  %v366_v18 = vld [vmem:[%s2363_s12 + $0xc8] sm:$0xff]  ;;  %v1626_v20 = vpack.c.bf16 %v361_v17, %v357_v16  ;;  %v365_v21 = vld [vmem:[%s2363_s12 + $0xc0] sm:$0xff]  ;;  %v1684_v38 = vpack.c.bf16 %v356_v35, %v352_v34  ;;  %v351_v39 = vld [vmem:[%s2363_s12 + $0x50] sm:$0xff]  ;;  %1683 = vmatpush1.bf16.msra.mxu1 %v1682_v33 }
  0x6c   : > { %v370_v19 = vld [vmem:[%s2363_s12 + $0xe8] sm:$0xff]  ;;  %v369_v23 = vld [vmem:[%s2363_s12 + $0xe0] sm:$0xff]  ;;  %v355_v40 = vld [vmem:[%s2363_s12 + $0x70] sm:$0xff] }
  0x6d   : > { %v1628_v22 = vpack.c.bf16 %v370_v19, %v366_v18  ;;  %v374_v26 = vld [vmem:[%s2363_s12 + $0x108] sm:$0xff]  ;;  %v1630_v31 = vpack.c.bf16 %v369_v23, %v365_v21  ;;  %v373_v32 = vld [vmem:[%s2363_s12 + $0x100] sm:$0xff]  ;;  %v1686_v43 = vpack.c.bf16 %v355_v40, %v351_v39  ;;  %v360_v44 = vld [vmem:[%s2363_s12 + $0x98] sm:$0xff]  ;;  %1685 = vmatprep.subr.bf16.mxu1 %v1684_v38 }
  0x6e   : > { %1623 = vmatpush1.bf16.msra.mxu0 %v1622_v14  ;;  %v378_v27 = vld [vmem:[%s2363_s12 + $0x128] sm:$0xff]  ;;  %v377_v37 = vld [vmem:[%s2363_s12 + $0x120] sm:$0xff]  ;;  %v364_v45 = vld [vmem:[%s2363_s12 + $0xb8] sm:$0xff] }
  0x6f   : > { %1625 = vmatprep.subr.bf16.mxu0 %v1624_v15  ;;  %v1632_v36 = vpack.c.bf16 %v378_v27, %v374_v26  ;;  %v382_v41 = vld [vmem:[%s2363_s12 + $0x148] sm:$0xff]  ;;  %v1634_v46 = vpack.c.bf16 %v377_v37, %v373_v32  ;;  %v381_v47 = vld [vmem:[%s2363_s12 + $0x140] sm:$0xff]  ;;  %v1688_v48 = vpack.c.bf16 %v364_v45, %v360_v44  ;;  %v359_v49 = vld [vmem:[%s2363_s12 + $0x90] sm:$0xff]  ;;  %1687 = vmatpush1.bf16.msra.mxu1 %v1686_v43 }
  0x70   : > { %v386_v42 = vld [vmem:[%s2363_s12 + $0x168] sm:$0xff]  ;;  %v363_v50 = vld [vmem:[%s2363_s12 + $0xb0] sm:$0xff]  ;;  %v385_v52 = vld [vmem:[%s2363_s12 + $0x160] sm:$0xff] }
  0x71   : > { %v1636_v51 = vpack.c.bf16 %v386_v42, %v382_v41  ;;  %v368_v53 = vld [vmem:[%s2363_s12 + $0xd8] sm:$0xff]  ;;  %v390_v55 = vld [vmem:[%s2363_s12 + $0x188] sm:$0xff]  ;;  %v1690_v57 = vpack.c.bf16 %v363_v50, %v359_v49  ;;  %1689 = vmatprep.subr.bf16.mxu1 %v1688_v48  ;;  %v367_v59 = vld [vmem:[%s2363_s12 + $0xd0] sm:$0xff]  ;;  %v1638_v61 = vpack.c.bf16 %v385_v52, %v381_v47 }
  0x72   : > { %1627 = vmatpush1.bf16.msra.mxu0 %v1626_v20  ;;  %v372_v54 = vld [vmem:[%s2363_s12 + $0xf8] sm:$0xff]  ;;  %v394_v56 = vld [vmem:[%s2363_s12 + $0x1a8] sm:$0xff]  ;;  %v371_v60 = vld [vmem:[%s2363_s12 + $0xf0] sm:$0xff] }
  0x73   : > { %1629 = vmatprep.subr.bf16.mxu0 %v1628_v22  ;;  %v1692_v58 = vpack.c.bf16 %v372_v54, %v368_v53  ;;  %v376_v62 = vld [vmem:[%s2363_s12 + $0x118] sm:$0xff]  ;;  %v1640_v0 = vpack.c.bf16 %v394_v56, %v390_v55  ;;  %v389_v1 = vld [vmem:[%s2363_s12 + $0x180] sm:$0xff]  ;;  %v398_v3 = vld [vmem:[%s2363_s12 + $0x1c8] sm:$0xff]  ;;  %1691 = vmatpush1.bf16.msra.mxu1 %v1690_v57  ;;  %v1694_v5 = vpack.c.bf16 %v371_v60, %v367_v59 }
  0x74   : > { %v380_v63 = vld [vmem:[%s2363_s12 + $0x138] sm:$0xff]  ;;  %v393_v2 = vld [vmem:[%s2363_s12 + $0x1a0] sm:$0xff]  ;;  %v402_v4 = vld [vmem:[%s2363_s12 + $0x1e8] sm:$0xff] }
  0x75   : > { %1693 = vmatprep.subr.bf16.mxu1 %v1692_v58  ;;  %v1696_v6 = vpack.c.bf16 %v380_v63, %v376_v62  ;;  %v375_v7 = vld [vmem:[%s2363_s12 + $0x110] sm:$0xff]  ;;  %v1642_v9 = vpack.c.bf16 %v393_v2, %v389_v1  ;;  %v384_v10 = vld [vmem:[%s2363_s12 + $0x158] sm:$0xff]  ;;  %v1644_v12 = vpack.c.bf16 %v402_v4, %v398_v3  ;;  %v397_v13 = vld [vmem:[%s2363_s12 + $0x1c0] sm:$0xff] }
  0x76   : > { %1631 = vmatpush1.bf16.msra.mxu0 %v1630_v31  ;;  %v379_v8 = vld [vmem:[%s2363_s12 + $0x130] sm:$0xff]  ;;  %v388_v11 = vld [vmem:[%s2363_s12 + $0x178] sm:$0xff]  ;;  %v401_v14 = vld [vmem:[%s2363_s12 + $0x1e0] sm:$0xff] }
  0x77   : > { %1633 = vmatprep.subr.bf16.mxu0 %v1632_v36  ;;  %v406_v15 = vld [vmem:[%s2363_s12 + $0x208] sm:$0xff]  ;;  %1695 = vmatpush1.bf16.msra.mxu1 %v1694_v5  ;;  %v1698_v17 = vpack.c.bf16 %v379_v8, %v375_v7  ;;  %v1700_v18 = vpack.c.bf16 %v388_v11, %v384_v10  ;;  %v383_v19 = vld [vmem:[%s2363_s12 + $0x150] sm:$0xff]  ;;  %v1646_v21 = vpack.c.bf16 %v401_v14, %v397_v13  ;;  %v392_v22 = vld [vmem:[%s2363_s12 + $0x198] sm:$0xff] }
  0x78   : > { %v410_v16 = vld [vmem:[%s2363_s12 + $0x228] sm:$0xff]  ;;  %1697 = vmatprep.subr.bf16.mxu1 %v1696_v6  ;;  %v387_v20 = vld [vmem:[%s2363_s12 + $0x170] sm:$0xff]  ;;  %v396_v23 = vld [vmem:[%s2363_s12 + $0x1b8] sm:$0xff] }
  0x79   : > { %v1648_v24 = vpack.c.bf16 %v410_v16, %v406_v15  ;;  %v405_v25 = vld [vmem:[%s2363_s12 + $0x200] sm:$0xff]  ;;  %v414_v27 = vld [vmem:[%s2363_s12 + $0x248] sm:$0xff]  ;;  %v1702_v29 = vpack.c.bf16 %v387_v20, %v383_v19  ;;  %v1704_v30 = vpack.c.bf16 %v396_v23, %v392_v22  ;;  %v391_v31 = vld [vmem:[%s2363_s12 + $0x190] sm:$0xff] }
  0x7a   : > { %1635 = vmatpush1.bf16.msra.mxu0 %v1634_v46  ;;  %v409_v26 = vld [vmem:[%s2363_s12 + $0x220] sm:$0xff]  ;;  %v418_v28 = vld [vmem:[%s2363_s12 + $0x268] sm:$0xff]  ;;  %v395_v32 = vld [vmem:[%s2363_s12 + $0x1b0] sm:$0xff] }
  0x7b   : > { %1637 = vmatprep.subr.bf16.mxu0 %v1636_v51  ;;  %1699 = vmatpush1.bf16.msra.mxu1 %v1698_v17  ;;  %v1650_v33 = vpack.c.bf16 %v409_v26, %v405_v25  ;;  %v400_v34 = vld [vmem:[%s2363_s12 + $0x1d8] sm:$0xff]  ;;  %v1652_v36 = vpack.c.bf16 %v418_v28, %v414_v27  ;;  %v413_v37 = vld [vmem:[%s2363_s12 + $0x240] sm:$0xff]  ;;  %v310_v39 = vld [vmem:[%s2379_s24 + $0x8] sm:$0xff]  ;;  %v1706_v42 = vpack.c.bf16 %v395_v32, %v391_v31 }
  0x7c   : > { %1701 = vmatprep.subr.bf16.mxu1 %v1700_v18  ;;  %v404_v35 = vld [vmem:[%s2363_s12 + $0x1f8] sm:$0xff]  ;;  %v417_v38 = vld [vmem:[%s2363_s12 + $0x260] sm:$0xff]  ;;  %v422_v40 = vld [vmem:[%s2363_s12 + $0x288] sm:$0xff]  ;;  %533 = vmatprep.mubr.f32.mxu0 %v310_v39 }
  0x7d   : > { %v426_v41 = vld [vmem:[%s2363_s12 + $0x2a8] sm:$0xff]  ;;  %v1708_v43 = vpack.c.bf16 %v404_v35, %v400_v34  ;;  %v399_v44 = vld [vmem:[%s2363_s12 + $0x1d0] sm:$0xff]  ;;  %694 = vmatprep.mubr.f32.mxu1 %v310_v39  ;;  %v1654_v46 = vpack.c.bf16 %v417_v38, %v413_v37  ;;  %v408_v47 = vld [vmem:[%s2363_s12 + $0x218] sm:$0xff] }
  0x7e   : > { %1639 = vmatpush1.bf16.msra.mxu0 %v1638_v61  ;;  %v403_v45 = vld [vmem:[%s2363_s12 + $0x1f0] sm:$0xff]  ;;  %v412_v48 = vld [vmem:[%s2363_s12 + $0x238] sm:$0xff]  ;;  %v1656_v49 = vpack.c.bf16 %v426_v41, %v422_v40  ;;  %v421_v50 = vld [vmem:[%s2363_s12 + $0x280] sm:$0xff] }
  0x7f   : > { %1641 = vmatprep.subr.bf16.mxu0 %v1640_v0  ;;  %1703 = vmatpush1.bf16.msra.mxu1 %v1702_v29  ;;  %v425_v51 = vld [vmem:[%s2363_s12 + $0x2a0] sm:$0xff]  ;;  %v430_v52 = vld [vmem:[%s2363_s12 + $0x2c8] sm:$0xff]  ;;  %v1710_v54 = vpack.c.bf16 %v403_v45, %v399_v44  ;;  %v1712_v55 = vpack.c.bf16 %v412_v48, %v408_v47  ;;  %v407_v56 = vld [vmem:[%s2363_s12 + $0x210] sm:$0xff] }
  0x80   : > { %1705 = vmatprep.subr.bf16.mxu1 %v1704_v30  ;;  %v434_v53 = vld [vmem:[%s2363_s12 + $0x2e8] sm:$0xff]  ;;  %v411_v57 = vld [vmem:[%s2363_s12 + $0x230] sm:$0xff]  ;;  %v1658_v58 = vpack.c.bf16 %v425_v51, %v421_v50  ;;  %v416_v59 = vld [vmem:[%s2363_s12 + $0x258] sm:$0xff] }
  0x81   : > { %v420_v60 = vld [vmem:[%s2363_s12 + $0x278] sm:$0xff]  ;;  %v1660_v61 = vpack.c.bf16 %v434_v53, %v430_v52  ;;  %v429_v62 = vld [vmem:[%s2363_s12 + $0x2c0] sm:$0xff]  ;;  %v438_v0 = vld [vmem:[%s2363_s12 + $0x308] sm:$0xff]  ;;  %v1714_v2 = vpack.c.bf16 %v411_v57, %v407_v56 }
  0x82   : > { %1643 = vmatpush1.bf16.msra.mxu0 %v1642_v9  ;;  %v433_v63 = vld [vmem:[%s2363_s12 + $0x2e0] sm:$0xff]  ;;  %v442_v1 = vld [vmem:[%s2363_s12 + $0x328] sm:$0xff]  ;;  %v1716_v3 = vpack.c.bf16 %v420_v60, %v416_v59  ;;  %v415_v4 = vld [vmem:[%s2363_s12 + $0x250] sm:$0xff] }
  0x83   : > { %1645 = vmatprep.subr.bf16.mxu0 %v1644_v12  ;;  %1707 = vmatpush1.bf16.msra.mxu1 %v1706_v42  ;;  %v419_v5 = vld [vmem:[%s2363_s12 + $0x270] sm:$0xff]  ;;  %v1662_v6 = vpack.c.bf16 %v433_v63, %v429_v62  ;;  %v424_v7 = vld [vmem:[%s2363_s12 + $0x298] sm:$0xff]  ;;  %v1664_v9 = vpack.c.bf16 %v442_v1, %v438_v0  ;;  %v437_v10 = vld [vmem:[%s2363_s12 + $0x300] sm:$0xff] }
  0x84   : > { %1709 = vmatprep.subr.bf16.mxu1 %v1708_v43  ;;  %v428_v8 = vld [vmem:[%s2363_s12 + $0x2b8] sm:$0xff]  ;;  %v441_v11 = vld [vmem:[%s2363_s12 + $0x320] sm:$0xff]  ;;  %v446_v12 = vld [vmem:[%s2363_s12 + $0x348] sm:$0xff]  ;;  %v1718_v14 = vpack.c.bf16 %v419_v5, %v415_v4 }
  0x85   : > { %v450_v13 = vld [vmem:[%s2363_s12 + $0x368] sm:$0xff]  ;;  %v1720_v15 = vpack.c.bf16 %v428_v8, %v424_v7  ;;  %v423_v16 = vld [vmem:[%s2363_s12 + $0x290] sm:$0xff]  ;;  %v1666_v18 = vpack.c.bf16 %v441_v11, %v437_v10  ;;  %v432_v19 = vld [vmem:[%s2363_s12 + $0x2d8] sm:$0xff] }
  0x86   : > { %1647 = vmatpush1.bf16.msra.mxu0 %v1646_v21  ;;  %v427_v17 = vld [vmem:[%s2363_s12 + $0x2b0] sm:$0xff]  ;;  %v436_v20 = vld [vmem:[%s2363_s12 + $0x2f8] sm:$0xff]  ;;  %v1668_v21 = vpack.c.bf16 %v450_v13, %v446_v12  ;;  %v445_v22 = vld [vmem:[%s2363_s12 + $0x340] sm:$0xff] }
  0x87   : > { %1649 = vmatprep.subr.bf16.mxu0 %v1648_v24  ;;  %1711 = vmatpush1.bf16.msra.mxu1 %v1710_v54  ;;  %v449_v23 = vld [vmem:[%s2363_s12 + $0x360] sm:$0xff]  ;;  %v454_v24 = vld [vmem:[%s2363_s12 + $0x388] sm:$0xff]  ;;  %v1722_v26 = vpack.c.bf16 %v427_v17, %v423_v16  ;;  %v1724_v27 = vpack.c.bf16 %v436_v20, %v432_v19  ;;  %v431_v28 = vld [vmem:[%s2363_s12 + $0x2d0] sm:$0xff] }
  0x88   : > { %1713 = vmatprep.subr.bf16.mxu1 %v1712_v55  ;;  %v458_v25 = vld [vmem:[%s2363_s12 + $0x3a8] sm:$0xff]  ;;  %v435_v29 = vld [vmem:[%s2363_s12 + $0x2f0] sm:$0xff]  ;;  %v1670_v30 = vpack.c.bf16 %v449_v23, %v445_v22  ;;  %v440_v31 = vld [vmem:[%s2363_s12 + $0x318] sm:$0xff] }
  0x89   : > { %v444_v32 = vld [vmem:[%s2363_s12 + $0x338] sm:$0xff]  ;;  %v453_v34 = vld [vmem:[%s2363_s12 + $0x380] sm:$0xff]  ;;  %v466_v37 = vld [vmem:[%s2363_s12 + $0x3e8] sm:$0xff]  ;;  %v1726_v38 = vpack.c.bf16 %v435_v29, %v431_v28 }
  0x8a   : > { %1651 = vmatpush1.bf16.msra.mxu0 %v1650_v33  ;;  %v1672_v33 = vpack.c.bf16 %v458_v25, %v454_v24  ;;  %v457_v35 = vld [vmem:[%s2363_s12 + $0x3a0] sm:$0xff]  ;;  %v1728_v39 = vpack.c.bf16 %v444_v32, %v440_v31  ;;  %v439_v40 = vld [vmem:[%s2363_s12 + $0x310] sm:$0xff]  ;;  %v448_v43 = vld [vmem:[%s2363_s12 + $0x358] sm:$0xff] }
  0x8b   : > { %1653 = vmatprep.subr.bf16.mxu0 %v1652_v36  ;;  %1715 = vmatpush1.bf16.msra.mxu1 %v1714_v2  ;;  %v462_v36 = vld [vmem:[%s2363_s12 + $0x3c8] sm:$0xff]  ;;  %v443_v41 = vld [vmem:[%s2363_s12 + $0x330] sm:$0xff]  ;;  %v1674_v42 = vpack.c.bf16 %v457_v35, %v453_v34  ;;  %v452_v44 = vld [vmem:[%s2363_s12 + $0x378] sm:$0xff] }
  0x8c   : > { %1717 = vmatprep.subr.bf16.mxu1 %v1716_v3  ;;  %v1676_v45 = vpack.c.bf16 %v466_v37, %v462_v36  ;;  %v465_v47 = vld [vmem:[%s2363_s12 + $0x3e0] sm:$0xff]  ;;  %v1730_v48 = vpack.c.bf16 %v443_v41, %v439_v40  ;;  %v1082_v50 = vld [vmem:[%s2369_s27 + $0x18] sm:$0xff]  ;;  %v1732_v51 = vpack.c.bf16 %v452_v44, %v448_v43  ;;  %v447_v52 = vld [vmem:[%s2363_s12 + $0x350] sm:$0xff] }
  0x8d   : > { %v451_v53 = vld [vmem:[%s2363_s12 + $0x370] sm:$0xff]  ;;  %v456_v55 = vld [vmem:[%s2363_s12 + $0x398] sm:$0xff]  ;;  %v309_v2 = vld [vmem:[%s2379_s24] sm:$0xff] }
  0x8e   : > { %1655 = vmatpush1.bf16.msra.mxu0 %v1654_v46  ;;  %v461_v46 = vld [vmem:[%s2363_s12 + $0x3c0] sm:$0xff]  ;;  %v460_v56 = vld [vmem:[%s2363_s12 + $0x3b8] sm:$0xff]  ;;  %v1081_v59 = vld [vmem:[%s2369_s27 + $0x10] sm:$0xff]  ;;  %v1734_v60 = vpack.c.bf16 %v451_v53, %v447_v52 }
  0x8f   : > { %1657 = vmatprep.subr.bf16.mxu0 %v1656_v49  ;;  %1719 = vmatpush1.bf16.msra.mxu1 %v1718_v14  ;;  %v1080_v49 = vld [vmem:[%s2369_s27 + $0x8] sm:$0xff]  ;;  %v1678_v54 = vpack.c.bf16 %v465_v47, %v461_v46  ;;  %v1086_v62 = vld [vmem:[%s2369_s27 + $0x38] sm:$0xff]  ;;  %v1736_v63 = vpack.c.bf16 %v460_v56, %v456_v55  ;;  %v455_v0 = vld [vmem:[%s2363_s12 + $0x390] sm:$0xff] }
  0x90   : > { %1721 = vmatprep.subr.bf16.mxu1 %v1720_v15  ;;  %v1744_v57 = vpack.c.bf16 %v1082_v50, %v1080_v49  ;;  %v459_v1 = vld [vmem:[%s2363_s12 + $0x3b0] sm:$0xff]  ;;  %v464_v3 = vld [vmem:[%s2363_s12 + $0x3d8] sm:$0xff]  ;;  %v1083_v8 = vld [vmem:[%s2369_s27 + $0x20] sm:$0xff] }
  0x91   : > { %v468_v4 = vld [vmem:[%s2363_s12 + $0x3f8] sm:$0xff]  ;;  %v1738_v10 = vpack.c.bf16 %v459_v1, %v455_v0  ;;  %v1088_v11 = vld [vmem:[%s2369_s27 + $0x48] sm:$0xff]  ;;  %v463_v14 = vld [vmem:[%s2363_s12 + $0x3d0] sm:$0xff] }
  0x92   : > { %1659 = vmatpush1.bf16.msra.mxu0 %v1658_v58  ;;  %v1079_v58 = vld [vmem:[%s2369_s27] sm:$0xff]  ;;  %v1090_v12 = vld [vmem:[%s2369_s27 + $0x58] sm:$0xff]  ;;  %v1740_v13 = vpack.c.bf16 %v468_v4, %v464_v3  ;;  %v467_v15 = vld [vmem:[%s2363_s12 + $0x3f0] sm:$0xff] }
  0x93   : > { %1661 = vmatprep.subr.bf16.mxu0 %v1660_v61  ;;  %1723 = vmatpush1.bf16.msra.mxu1 %v1722_v26  ;;  %v1084_v61 = vld [vmem:[%s2369_s27 + $0x28] sm:$0xff]  ;;  %v1746_v5 = vpack.c.bf16 %v1081_v59, %v1079_v58  ;;  %v311_v16 = vld [vmem:[%s2379_s24 + $0x10] sm:$0xff]  ;;  %v1752_v19 = vpack.c.bf16 %v1090_v12, %v1088_v11  ;;  %v1087_v20 = vld [vmem:[%s2369_s27 + $0x40] sm:$0xff]  ;;  %v1742_v22 = vpack.c.bf16 %v467_v15, %v463_v14 }
  0x94   : > { %1725 = vmatprep.subr.bf16.mxu1 %v1724_v27  ;;  %v1748_v7 = vpack.c.bf16 %v1086_v62, %v1084_v61  ;;  %v1092_v23 = vld [vmem:[%s2369_s27 + $0x68] sm:$0xff]  ;;  %v1094_v24 = vld [vmem:[%s2369_s27 + $0x78] sm:$0xff]  ;;  %v313_v25 = vld [vmem:[%s2379_s24 + $0x20] sm:$0xff] }
  0x95   : > { %v316_v27 = vld [vmem:[%s2379_s24 + $0x38] sm:$0xff]  ;;  %v1756_v28 = vpack.c.bf16 %v1094_v24, %v1092_v23  ;;  %v1091_v29 = vld [vmem:[%s2369_s27 + $0x60] sm:$0xff]  ;;  %v1096_v31 = vld [vmem:[%s2369_s27 + $0x88] sm:$0xff] }
  0x96   : > { %1663 = vmatpush1.bf16.msra.mxu0 %v1662_v6  ;;  %v312_v6 = vld [vmem:[%s2379_s24 + $0x18] sm:$0xff]  ;;  %v318_v35 = vld [vmem:[%s2379_s24 + $0x48] sm:$0xff]  ;;  %v1095_v37 = vld [vmem:[%s2369_s27 + $0x80] sm:$0xff] }
  0x97   : > { %1665 = vmatprep.subr.bf16.mxu0 %v1664_v9  ;;  %1727 = vmatpush1.bf16.msra.mxu1 %v1726_v38  ;;  %v1085_v9 = vld [vmem:[%s2369_s27 + $0x30] sm:$0xff]  ;;  %v1098_v32 = vld [vmem:[%s2369_s27 + $0x98] sm:$0xff]  ;;  %v317_v41 = vld [vmem:[%s2379_s24 + $0x40] sm:$0xff] }
  0x98   : > { %1729 = vmatprep.subr.bf16.mxu1 %v1728_v39  ;;  %v1750_v17 = vpack.c.bf16 %v1085_v9, %v1083_v8  ;;  %v1760_v36 = vpack.c.bf16 %v1098_v32, %v1096_v31  ;;  %v1097_v38 = vld [vmem:[%s2369_s27 + $0x90] sm:$0xff]  ;;  %v1100_v39 = vld [vmem:[%s2369_s27 + $0xa8] sm:$0xff]  ;;  %v1102_v40 = vld [vmem:[%s2369_s27 + $0xb8] sm:$0xff] }
  0x99   : > { %v320_v43 = vld [vmem:[%s2379_s24 + $0x58] sm:$0xff]  ;;  %v1764_v44 = vpack.c.bf16 %v1102_v40, %v1100_v39  ;;  %v1101_v46 = vld [vmem:[%s2369_s27 + $0xb0] sm:$0xff]  ;;  %v1104_v47 = vld [vmem:[%s2369_s27 + $0xc8] sm:$0xff] }
  0x9a   : > { %1667 = vmatpush1.bf16.msra.mxu0 %v1666_v18  ;;  %v314_v18 = vld [vmem:[%s2379_s24 + $0x28] sm:$0xff]  ;;  %v319_v49 = vld [vmem:[%s2379_s24 + $0x50] sm:$0xff]  ;;  %v1103_v53 = vld [vmem:[%s2369_s27 + $0xc0] sm:$0xff] }
  0x9b   : > { %1669 = vmatprep.subr.bf16.mxu0 %v1668_v21  ;;  %1731 = vmatpush1.bf16.msra.mxu1 %v1730_v48  ;;  %v1089_v21 = vld [vmem:[%s2369_s27 + $0x50] sm:$0xff]  ;;  %v1106_v48 = vld [vmem:[%s2369_s27 + $0xd8] sm:$0xff]  ;;  %v1108_v55 = vld [vmem:[%s2369_s27 + $0xe8] sm:$0xff] }
  0x9c   : > { %1733 = vmatprep.subr.bf16.mxu1 %v1732_v51  ;;  %v1754_v26 = vpack.c.bf16 %v1089_v21, %v1087_v20  ;;  %v322_v51 = vld [vmem:[%s2379_s24 + $0x68] sm:$0xff]  ;;  %v1768_v52 = vpack.c.bf16 %v1106_v48, %v1104_v47  ;;  %v1110_v56 = vld [vmem:[%s2369_s27 + $0xf8] sm:$0xff]  ;;  %v1107_v61 = vld [vmem:[%s2369_s27 + $0xe0] sm:$0xff] }
  0x9d   : > { %v324_v59 = vld [vmem:[%s2379_s24 + $0x78] sm:$0xff]  ;;  %v1109_v62 = vld [vmem:[%s2369_s27 + $0xf0] sm:$0xff]  ;;  %v326_v1 = vld [vmem:[%s2379_s24 + $0x88] sm:$0xff] }
  0x9e   : > { %1671 = vmatpush1.bf16.msra.mxu0 %v1670_v30  ;;  %v1093_v30 = vld [vmem:[%s2369_s27 + $0x70] sm:$0xff]  ;;  %v1774_v0 = vpack.c.bf16 %v1109_v62, %v1107_v61  ;;  %v328_v3 = vld [vmem:[%s2379_s24 + $0x98] sm:$0xff]  ;;  %v334_v9 = vld [vmem:[%s2379_s24 + $0xc8] sm:$0xff] }
  0x9f   : > { %1673 = vmatprep.subr.bf16.mxu0 %v1672_v33  ;;  %1735 = vmatpush1.bf16.msra.mxu1 %v1734_v60  ;;  %v315_v33 = vld [vmem:[%s2379_s24 + $0x30] sm:$0xff]  ;;  %v1758_v34 = vpack.c.bf16 %v1093_v30, %v1091_v29  ;;  %v1772_v60 = vpack.c.bf16 %v1110_v56, %v1108_v55  ;;  %v336_v11 = vld [vmem:[%s2379_s24 + $0xd8] sm:$0xff]  ;;  %v337_v14 = vld [vmem:[%s2379_s24 + $0xe0] sm:$0xff] }
  0xa0   : > { %1737 = vmatprep.subr.bf16.mxu1 %v1736_v63  ;;  %v323_v63 = vld [vmem:[%s2379_s24 + $0x70] sm:$0xff]  ;;  %v340_v15 = vld [vmem:[%s2379_s24 + $0xf8] sm:$0xff]  ;;  %v1111_v20 = vld [vmem:[%s2369_s27 + $0x100] sm:$0xff] }
  0xa1   : > { %v327_v4 = vld [vmem:[%s2379_s24 + $0x90] sm:$0xff]  ;;  %v1116_v23 = vld [vmem:[%s2369_s27 + $0x128] sm:$0xff]  ;;  %v1118_v24 = vld [vmem:[%s2369_s27 + $0x138] sm:$0xff] }
  0xa2   : > { %1675 = vmatpush1.bf16.msra.mxu0 %v1674_v42  ;;  %v1762_v42 = vpack.c.bf16 %v1097_v38, %v1095_v37  ;;  %v331_v8 = vld [vmem:[%s2379_s24 + $0xb0] sm:$0xff]  ;;  %v1120_v29 = vld [vmem:[%s2369_s27 + $0x148] sm:$0xff]  ;;  %v1122_v30 = vld [vmem:[%s2369_s27 + $0x158] sm:$0xff] }
  0xa3   : > { %1677 = vmatprep.subr.bf16.mxu0 %v1676_v45  ;;  %1739 = vmatpush1.bf16.msra.mxu1 %v1738_v10  ;;  %v1099_v45 = vld [vmem:[%s2369_s27 + $0xa0] sm:$0xff]  ;;  %v335_v12 = vld [vmem:[%s2379_s24 + $0xd0] sm:$0xff]  ;;  %v1784_v31 = vpack.c.bf16 %v1122_v30, %v1120_v29  ;;  %v1132_v47 = vld [vmem:[%s2369_s27 + $0x1a8] sm:$0xff] }
  0xa4   : > { %1741 = vmatprep.subr.bf16.mxu1 %v1740_v13  ;;  %v1766_v50 = vpack.c.bf16 %v1101_v46, %v1099_v45  ;;  %v333_v10 = vld [vmem:[%s2379_s24 + $0xc0] sm:$0xff]  ;;  %v338_v13 = vld [vmem:[%s2379_s24 + $0xe8] sm:$0xff]  ;;  %v1113_v21 = vld [vmem:[%s2369_s27 + $0x110] sm:$0xff] }
  0xa5   : > { %v1119_v32 = vld [vmem:[%s2369_s27 + $0x140] sm:$0xff]  ;;  %v1125_v39 = vld [vmem:[%s2369_s27 + $0x170] sm:$0xff]  ;;  %v1134_v48 = vld [vmem:[%s2369_s27 + $0x1b8] sm:$0xff] }
  0xa6   : > { %1679 = vmatpush1.bf16.msra.mxu0 %v1678_v54  ;;  %v1105_v54 = vld [vmem:[%s2369_s27 + $0xd0] sm:$0xff]  ;;  %v1123_v38 = vld [vmem:[%s2369_s27 + $0x160] sm:$0xff] }
  0xa7   : > { %1745 = vmatprep.subr.bf16.mxu0 %v1744_v57  ;;  %1743 = vmatpush1.bf16.msra.mxu1 %v1742_v22  ;;  %v1770_v58 = vpack.c.bf16 %v1105_v54, %v1103_v53  ;;  %v1778_v22 = vpack.c.bf16 %v1113_v21, %v1111_v20  ;;  %v1790_v40 = vpack.c.bf16 %v1125_v39, %v1123_v38  ;;  %v1129_v45 = vld [vmem:[%s2369_s27 + $0x190] sm:$0xff]  ;;  %v1136_v53 = vld [vmem:[%s2369_s27 + $0x1c8] sm:$0xff]  ;;  %v1138_v54 = vld [vmem:[%s2369_s27 + $0x1d8] sm:$0xff] }
  0xa8   : > { %1808 = vmatprep.subr.bf16.mxu1 %v1744_v57  ;;  %v321_v57 = vld [vmem:[%s2379_s24 + $0x60] sm:$0xff]  ;;  %v1800_v55 = vpack.c.bf16 %v1138_v54, %v1136_v53 }
  0xa9   : > { %534 = vmatmul.mubr.f32.vlgmr.msra.gmra.mrb[0].mxu0 %v309_v2  ;;  %v1135_v56 = vld [vmem:[%s2369_s27 + $0x1c0] sm:$0xff] }
  0xaa   : > { %539 = vmatprep.mubr.f32.mxu0 %v312_v6  ;;  %1747 = vmatpush1.bf16.msra.mxu0 %v1746_v5  ;;  %v1139_v62 = vld [vmem:[%s2369_s27 + $0x1e0] sm:$0xff] }
  0xab   : > { %1749 = vmatprep.subr.bf16.mxu0 %v1748_v7  ;;  %695 = vmatmul.mubr.f32.vlgmr.msra.gmra.mrb[0].mxu1 %v309_v2  ;;  %v325_v2 = vld [vmem:[%s2379_s24 + $0x80] sm:$0xff] }
  0xac   : > { %700 = vmatprep.mubr.f32.mxu1 %v312_v6  ;;  %1824 = vmatpush1.bf16.msra.mxu1 %v1746_v5  ;;  %v330_v5 = vld [vmem:[%s2379_s24 + $0xa8] sm:$0xff]  ;;  %v329_v6 = vld [vmem:[%s2379_s24 + $0xa0] sm:$0xff] }
  0xad   : > { %540 = vmatmul.mubr.f32.gmra.mrb[2].mxu0 %v311_v16  ;;  %1809 = vmatprep.subr.bf16.mxu1 %v1748_v7  ;;  %v332_v7 = vld [vmem:[%s2379_s24 + $0xb8] sm:$0xff] }
  0xae   : > { %545 = vmatprep.mubr.f32.mxu0 %v314_v18  ;;  %1751 = vmatpush1.bf16.msra.mxu0 %v1750_v17 }
  0xaf   : > { %1753 = vmatprep.subr.bf16.mxu0 %v1752_v19  ;;  %701 = vmatmul.mubr.f32.gmra.mrb[2].mxu1 %v311_v16  ;;  %v339_v16 = vld [vmem:[%s2379_s24 + $0xf0] sm:$0xff] }
  0xb0   : > { %706 = vmatprep.mubr.f32.mxu1 %v314_v18  ;;  %1825 = vmatpush1.bf16.msra.mxu1 %v1750_v17  ;;  %v1112_v17 = vld [vmem:[%s2369_s27 + $0x108] sm:$0xff]  ;;  %v1114_v18 = vld [vmem:[%s2369_s27 + $0x118] sm:$0xff] }
  0xb1   : > { %546 = vmatmul.mubr.f32.gmra.mrb[4].mxu0 %v313_v25  ;;  %1810 = vmatprep.subr.bf16.mxu1 %v1752_v19  ;;  %v1776_v19 = vpack.c.bf16 %v1114_v18, %v1112_v17 }
  0xb2   : > { %551 = vmatprep.mubr.f32.mxu0 %v316_v27  ;;  %1755 = vmatpush1.bf16.msra.mxu0 %v1754_v26 }
  0xb3   : > { %1757 = vmatprep.subr.bf16.mxu0 %v1756_v28  ;;  %707 = vmatmul.mubr.f32.gmra.mrb[4].mxu1 %v313_v25  ;;  %v1780_v25 = vpack.c.bf16 %v1118_v24, %v1116_v23 }
  0xb4   : > { %712 = vmatprep.mubr.f32.mxu1 %v316_v27  ;;  %1826 = vmatpush1.bf16.msra.mxu1 %v1754_v26  ;;  %v1115_v26 = vld [vmem:[%s2369_s27 + $0x120] sm:$0xff]  ;;  %v1117_v27 = vld [vmem:[%s2369_s27 + $0x130] sm:$0xff] }
  0xb5   : > { %552 = vmatmul.mubr.f32.gmra.mrb[6].mxu0 %v315_v33  ;;  %1811 = vmatprep.subr.bf16.mxu1 %v1756_v28  ;;  %v1782_v28 = vpack.c.bf16 %v1117_v27, %v1115_v26 }
  0xb6   : > { %557 = vmatprep.mubr.f32.mxu0 %v318_v35  ;;  %1759 = vmatpush1.bf16.msra.mxu0 %v1758_v34 }
  0xb7   : > { %1761 = vmatprep.subr.bf16.mxu0 %v1760_v36  ;;  %713 = vmatmul.mubr.f32.gmra.mrb[6].mxu1 %v315_v33  ;;  %v1121_v33 = vld [vmem:[%s2369_s27 + $0x150] sm:$0xff] }
  0xb8   : > { %718 = vmatprep.mubr.f32.mxu1 %v318_v35  ;;  %1827 = vmatpush1.bf16.msra.mxu1 %v1758_v34  ;;  %v1786_v34 = vpack.c.bf16 %v1121_v33, %v1119_v32  ;;  %v1124_v35 = vld [vmem:[%s2369_s27 + $0x168] sm:$0xff] }
  0xb9   : > { %558 = vmatmul.mubr.f32.gmra.mrb[8].mxu0 %v317_v41  ;;  %1812 = vmatprep.subr.bf16.mxu1 %v1760_v36  ;;  %v1126_v36 = vld [vmem:[%s2369_s27 + $0x178] sm:$0xff] }
  0xba   : > { %563 = vmatprep.mubr.f32.mxu0 %v320_v43  ;;  %1763 = vmatpush1.bf16.msra.mxu0 %v1762_v42  ;;  %v1788_v37 = vpack.c.bf16 %v1126_v36, %v1124_v35 }
  0xbb   : > { %1765 = vmatprep.subr.bf16.mxu0 %v1764_v44  ;;  %719 = vmatmul.mubr.f32.gmra.mrb[8].mxu1 %v317_v41  ;;  %v1128_v41 = vld [vmem:[%s2369_s27 + $0x188] sm:$0xff] }
  0xbc   : > { %724 = vmatprep.mubr.f32.mxu1 %v320_v43  ;;  %1828 = vmatpush1.bf16.msra.mxu1 %v1762_v42  ;;  %v1130_v42 = vld [vmem:[%s2369_s27 + $0x198] sm:$0xff] }
  0xbd   : > { %564 = vmatmul.mubr.f32.gmra.mrb[10].mxu0 %v319_v49  ;;  %1813 = vmatprep.subr.bf16.mxu1 %v1764_v44  ;;  %v1792_v43 = vpack.c.bf16 %v1130_v42, %v1128_v41  ;;  %v1127_v44 = vld [vmem:[%s2369_s27 + $0x180] sm:$0xff] }
  0xbe   : > { %569 = vmatprep.mubr.f32.mxu0 %v322_v51  ;;  %1767 = vmatpush1.bf16.msra.mxu0 %v1766_v50  ;;  %v1794_v46 = vpack.c.bf16 %v1129_v45, %v1127_v44 }
  0xbf   : > { %1769 = vmatprep.subr.bf16.mxu0 %v1768_v52  ;;  %725 = vmatmul.mubr.f32.gmra.mrb[10].mxu1 %v319_v49  ;;  %v1796_v49 = vpack.c.bf16 %v1134_v48, %v1132_v47 }
  0xc0   : > { %730 = vmatprep.mubr.f32.mxu1 %v322_v51  ;;  %1829 = vmatpush1.bf16.msra.mxu1 %v1766_v50  ;;  %v1131_v50 = vld [vmem:[%s2369_s27 + $0x1a0] sm:$0xff]  ;;  %v1133_v51 = vld [vmem:[%s2369_s27 + $0x1b0] sm:$0xff] }
  0xc1   : > { %570 = vmatmul.mubr.f32.gmra.mrb[12].mxu0 %v321_v57  ;;  %1814 = vmatprep.subr.bf16.mxu1 %v1768_v52  ;;  %v1798_v52 = vpack.c.bf16 %v1133_v51, %v1131_v50 }
  0xc2   : > { %575 = vmatprep.mubr.f32.mxu0 %v324_v59  ;;  %1771 = vmatpush1.bf16.msra.mxu0 %v1770_v58 }
  0xc3   : > { %1773 = vmatprep.subr.bf16.mxu0 %v1772_v60  ;;  %731 = vmatmul.mubr.f32.gmra.mrb[12].mxu1 %v321_v57  ;;  %v1137_v57 = vld [vmem:[%s2369_s27 + $0x1d0] sm:$0xff] }
  0xc4   : > { %736 = vmatprep.mubr.f32.mxu1 %v324_v59  ;;  %1830 = vmatpush1.bf16.msra.mxu1 %v1770_v58  ;;  %v1802_v58 = vpack.c.bf16 %v1137_v57, %v1135_v56  ;;  %v1140_v59 = vld [vmem:[%s2369_s27 + $0x1e8] sm:$0xff] }
  0xc5   : > { %576 = vmatmul.mubr.f32.gmra.mrb[14].mxu0 %v323_v63  ;;  %1815 = vmatprep.subr.bf16.mxu1 %v1772_v60  ;;  %v1142_v60 = vld [vmem:[%s2369_s27 + $0x1f8] sm:$0xff] }
  0xc6   : > { %581 = vmatprep.mubr.f32.mxu0 %v326_v1  ;;  %1775 = vmatpush1.bf16.msra.mxu0 %v1774_v0  ;;  %v1804_v61 = vpack.c.bf16 %v1142_v60, %v1140_v59 }
  0xc7   : > { %737 = vmatmul.mubr.f32.gmra.mrb[14].mxu1 %v323_v63  ;;  %1777 = vmatprep.subr.bf16.mxu0 %v1776_v19  ;;  %v1141_v63 = vld [vmem:[%s2369_s27 + $0x1f0] sm:$0xff] }
  0xc8   : > { %742 = vmatprep.mubr.f32.mxu1 %v326_v1  ;;  %1831 = vmatpush1.bf16.msra.mxu1 %v1774_v0  ;;  %v1806_v0 = vpack.c.bf16 %v1141_v63, %v1139_v62 }
  0xc9   : > { %582 = vmatmul.mubr.f32.gmra.mrb[16].mxu0 %v325_v2  ;;  %1816 = vmatprep.subr.bf16.mxu1 %v1776_v19 }
  0xca   : > { %587 = vmatprep.mubr.f32.mxu0 %v328_v3  ;;  %1779 = vmatpush1.bf16.msra.mxu0 %v1778_v22 }
  0xcb   : > { %743 = vmatmul.mubr.f32.gmra.mrb[16].mxu1 %v325_v2  ;;  %1781 = vmatprep.subr.bf16.mxu0 %v1780_v25 }
  0xcc   : > { %748 = vmatprep.mubr.f32.mxu1 %v328_v3  ;;  %1832 = vmatpush1.bf16.msra.mxu1 %v1778_v22 }
  0xcd   : > { %588 = vmatmul.mubr.f32.gmra.mrb[18].mxu0 %v327_v4  ;;  %1817 = vmatprep.subr.bf16.mxu1 %v1780_v25 }
  0xce   : > { %593 = vmatprep.mubr.f32.mxu0 %v330_v5  ;;  %1783 = vmatpush1.bf16.msra.mxu0 %v1782_v28 }
  0xcf   : > { %749 = vmatmul.mubr.f32.gmra.mrb[18].mxu1 %v327_v4  ;;  %1785 = vmatprep.subr.bf16.mxu0 %v1784_v31 }
  0xd0   : > { %754 = vmatprep.mubr.f32.mxu1 %v330_v5  ;;  %1833 = vmatpush1.bf16.msra.mxu1 %v1782_v28 }
  0xd1   : > { %594 = vmatmul.mubr.f32.gmra.mrb[20].mxu0 %v329_v6  ;;  %1818 = vmatprep.subr.bf16.mxu1 %v1784_v31 }
  0xd2   : > { %599 = vmatprep.mubr.f32.mxu0 %v332_v7  ;;  %1787 = vmatpush1.bf16.msra.mxu0 %v1786_v34 }
  0xd3   : > { %755 = vmatmul.mubr.f32.gmra.mrb[20].mxu1 %v329_v6  ;;  %1789 = vmatprep.subr.bf16.mxu0 %v1788_v37 }
  0xd4   : > { %760 = vmatprep.mubr.f32.mxu1 %v332_v7  ;;  %1834 = vmatpush1.bf16.msra.mxu1 %v1786_v34 }
  0xd5   : > { %600 = vmatmul.mubr.f32.gmra.mrb[22].mxu0 %v331_v8  ;;  %1819 = vmatprep.subr.bf16.mxu1 %v1788_v37 }
  0xd6   : > { %605 = vmatprep.mubr.f32.mxu0 %v334_v9  ;;  %1791 = vmatpush1.bf16.msra.mxu0 %v1790_v40 }
  0xd7   : > { %761 = vmatmul.mubr.f32.gmra.mrb[22].mxu1 %v331_v8  ;;  %1793 = vmatprep.subr.bf16.mxu0 %v1792_v43 }
  0xd8   : > { %766 = vmatprep.mubr.f32.mxu1 %v334_v9  ;;  %1835 = vmatpush1.bf16.msra.mxu1 %v1790_v40 }
  0xd9   : > { %606 = vmatmul.mubr.f32.gmra.mrb[24].mxu0 %v333_v10  ;;  %1820 = vmatprep.subr.bf16.mxu1 %v1792_v43 }
  0xda   : > { %611 = vmatprep.mubr.f32.mxu0 %v336_v11  ;;  %1795 = vmatpush1.bf16.msra.mxu0 %v1794_v46 }
  0xdb   : > { %767 = vmatmul.mubr.f32.gmra.mrb[24].mxu1 %v333_v10  ;;  %1797 = vmatprep.subr.bf16.mxu0 %v1796_v49 }
  0xdc   : > { %772 = vmatprep.mubr.f32.mxu1 %v336_v11  ;;  %1836 = vmatpush1.bf16.msra.mxu1 %v1794_v46 }
  0xdd   : > { %612 = vmatmul.mubr.f32.gmra.mrb[26].mxu0 %v335_v12  ;;  %1821 = vmatprep.subr.bf16.mxu1 %v1796_v49 }
  0xde   : > { %617 = vmatprep.mubr.f32.mxu0 %v338_v13  ;;  %1799 = vmatpush1.bf16.msra.mxu0 %v1798_v52 }
  0xdf   : > { %773 = vmatmul.mubr.f32.gmra.mrb[26].mxu1 %v335_v12  ;;  %1801 = vmatprep.subr.bf16.mxu0 %v1800_v55 }
  0xe0   : > { %778 = vmatprep.mubr.f32.mxu1 %v338_v13  ;;  %1837 = vmatpush1.bf16.msra.mxu1 %v1798_v52 }
  0xe1   : > { %618 = vmatmul.mubr.f32.gmra.mrb[28].mxu0 %v337_v14  ;;  %1822 = vmatprep.subr.bf16.mxu1 %v1800_v55 }
  0xe2   : > { %623 = vmatprep.mubr.f32.mxu0 %v340_v15  ;;  %1803 = vmatpush1.bf16.msra.mxu0 %v1802_v58 }
  0xe3   : > { %779 = vmatmul.mubr.f32.gmra.mrb[28].mxu1 %v337_v14  ;;  %1805 = vmatprep.subr.bf16.mxu0 %v1804_v61 }
  0xe4   : > { %784 = vmatprep.mubr.f32.mxu1 %v340_v15  ;;  %1838 = vmatpush1.bf16.msra.mxu1 %v1802_v58 }
  0xe5   : > { %624 = vmatmul.mubr.f32.gmra.mrb[30].mxu0 %v339_v16  ;;  %1823 = vmatprep.subr.bf16.mxu1 %v1804_v61 }
  0xe6   : > { %1807 = vmatpush1.bf16.msra.mxu0 %v1806_v0 }
  0xe7   : > { %785 = vmatmul.mubr.f32.gmra.mrb[30].mxu1 %v339_v16 }
  0xe8   : > { %1839 = vmatpush1.bf16.msra.mxu1 %v1806_v0 }
 0x17c   : > { %v2611_v1 = vpop.f32.mrb[0].mxu0 }
 0x17d   : > { %v1576_v2 = vmul.f32 -1.442695, %v2611_v1  ;;  %v2614_v3 = vpop.f32.mrb[1].mxu0 }
 0x17e   : > { %v1577_v4 = vmul.f32 -1.442695, %v2614_v3  ;;  %v2629_v13 = vpop.f32.mrb[0].mxu1 }
 0x17f   : > { %1921 = vpow2.f32 %v1576_v2  ;;  %v2631_v14 = vpop.f32.mrb[1].mxu1 }
 0x180   : > { %1923 = vpow2.f32 %v1577_v4  ;;  %v2617_v5 = vpop.f32.mrb[2].mxu0 }
 0x181   : > { %v1578_v6 = vmul.f32 -1.442695, %v2617_v5  ;;  %v2620_v7 = vpop.f32.mrb[3].mxu0 }
 0x182   : > { %v1579_v8 = vmul.f32 -1.442695, %v2620_v7  ;;  %v2639_v22 = vpop.f32.mrb[2].mxu1 }
 0x183   : > { %1925 = vpow2.f32 %v1578_v6  ;;  %v2641_v24 = vpop.f32.mrb[3].mxu1 }
 0x184   : > { %1927 = vpow2.f32 %v1579_v8  ;;  %v2623_v9 = vpop.f32.mrb[4].mxu0 }
 0x185   : > { %v1580_v10 = vmul.f32 -1.442695, %v2623_v9  ;;  %v2626_v11 = vpop.f32.mrb[5].mxu0 }
 0x186   : > { %v1581_v12 = vmul.f32 -1.442695, %v2626_v11  ;;  %v2649_v32 = vpop.f32.mrb[4].mxu1 }
 0x187   : > { %1929 = vpow2.f32 %v1580_v10  ;;  %v2651_v34 = vpop.f32.mrb[5].mxu1 }
 0x188   : > { %1931 = vpow2.f32 %v1581_v12  ;;  %v2633_v15 = vpop.f32.mrb[6].mxu0 }
 0x189   : > { %v1922_v16 = vpop.eup %1921  ;;  %v1582_v17 = vmul.f32 -1.442695, %v2633_v15  ;;  %v2636_v18 = vpop.f32.mrb[7].mxu0 }
 0x18a   : > { %v1924_v19 = vpop.eup %1923  ;;  %v887_v20 = vadd.f32 1.0, %v1922_v16  ;;  %v1583_v21 = vmul.f32 -1.442695, %v2636_v18  ;;  %v2659_v42 = vpop.f32.mrb[6].mxu1 }
 0x18b   : > { %v888_v23 = vadd.f32 1.0, %v1924_v19  ;;  %1933 = vpow2.f32 %v1582_v17  ;;  %v2661_v44 = vpop.f32.mrb[7].mxu1 }
 0x18c   : > { %1935 = vrcp.f32 %v887_v20  ;;  %v2643_v25 = vpop.f32.mrb[8].mxu0 }
 0x18d   : > { %v1926_v26 = vpop.eup %1925  ;;  %1937 = vrcp.f32 %v888_v23  ;;  %v1584_v27 = vmul.f32 -1.442695, %v2643_v25  ;;  %v2646_v28 = vpop.f32.mrb[9].mxu0 }
 0x18e   : > { %v1928_v29 = vpop.eup %1927  ;;  %v889_v30 = vadd.f32 1.0, %v1926_v26  ;;  %1939 = vpow2.f32 %v1583_v21  ;;  %v1585_v31 = vmul.f32 -1.442695, %v2646_v28  ;;  %v2669_v52 = vpop.f32.mrb[8].mxu1 }
 0x18f   : > { %v890_v33 = vadd.f32 1.0, %v1928_v29  ;;  %1941 = vpow2.f32 %v1584_v27  ;;  %v2672_v55 = vpop.f32.mrb[9].mxu1 }
 0x190   : > { %1943 = vrcp.f32 %v889_v30  ;;  %v2653_v35 = vpop.f32.mrb[10].mxu0 }
 0x191   : > { %v1930_v36 = vpop.eup %1929  ;;  %1945 = vrcp.f32 %v890_v33  ;;  %v1586_v37 = vmul.f32 -1.442695, %v2653_v35  ;;  %v2656_v38 = vpop.f32.mrb[11].mxu0 }
 0x192   : > { %v1932_v39 = vpop.eup %1931  ;;  %v891_v40 = vadd.f32 1.0, %v1930_v36  ;;  %1947 = vpow2.f32 %v1585_v31  ;;  %v1587_v41 = vmul.f32 -1.442695, %v2656_v38  ;;  %v2683_v6 = vpop.f32.mrb[10].mxu1 }
 0x193   : > { %v892_v43 = vadd.f32 1.0, %v1932_v39  ;;  %1949 = vpow2.f32 %v1586_v37  ;;  %v2686_v10 = vpop.f32.mrb[11].mxu1 }
 0x194   : > { %1951 = vrcp.f32 %v891_v40  ;;  %v2663_v45 = vpop.f32.mrb[12].mxu0 }
 0x195   : > { %v1934_v46 = vpop.eup %1933  ;;  %1953 = vrcp.f32 %v892_v43  ;;  %v1588_v47 = vmul.f32 -1.442695, %v2663_v45  ;;  %v2666_v48 = vpop.f32.mrb[13].mxu0 }
 0x196   : > { %v1936_v49 = vpop.eup %1935  ;;  %v893_v50 = vadd.f32 1.0, %v1934_v46  ;;  %1955 = vpow2.f32 %v1587_v41  ;;  %v1589_v51 = vmul.f32 -1.442695, %v2666_v48  ;;  %v2697_v27 = vpop.f32.mrb[12].mxu1 }
 0x197   : > { %v1938_v53 = vpop.eup %1937  ;;  %v983_v54 = vmul.f32 %v1936_v49, %v2611_v1  ;;  %1957 = vpow2.f32 %v1588_v47  ;;  %v2700_v31 = vpop.f32.mrb[13].mxu1 }
 0x198   : > { %v1940_v56 = vpop.eup %1939  ;;  %v984_v57 = vmul.f32 %v1938_v53, %v2614_v3  ;;  %1959 = vrcp.f32 %v893_v50  ;;  %v2675_v58 = vpop.f32.mrb[14].mxu0 }
 0x199   : > { %v1942_v59 = vpop.eup %1941  ;;  %v894_v60 = vadd.f32 1.0, %v1940_v56  ;;  %1961 = vpow2.f32 %v1589_v51  ;;  %v1015_v61 = vmul.f32 %v983_v54, %v2629_v13  ;;  %v1590_v62 = vmul.f32 -1.442695, %v2675_v58  ;;  %v2679_v63 = vpop.f32.mrb[15].mxu0 }
 0x19a   : > { %v1944_v0 = vpop.eup %1943  ;;  %v895_v1 = vadd.f32 1.0, %v1942_v59  ;;  %v1016_v2 = vmul.f32 %v984_v57, %v2631_v14  ;;  %v1591_v4 = vmul.f32 -1.442695, %v2679_v63 }
 0x19b   : > { %v1946_v3 = vpop.eup %1945  ;;  %v985_v8 = vmul.f32 %v1944_v0, %v2617_v5  ;;  %1963 = vrcp.f32 %v894_v60 }
 0x19c   : > { %v1948_v12 = vpop.eup %1947  ;;  %v986_v13 = vmul.f32 %v1946_v3, %v2620_v7  ;;  %1965 = vrcp.f32 %v895_v1  ;;  %v2689_v16 = vpop.f32.mrb[16].mxu0  ;;  %1207 = vmatprep.mubr.f32.mxu0 %v1016_v2 }
 0x19d   : > { %v1950_v17 = vpop.eup %1949  ;;  %v896_v19 = vadd.f32 1.0, %v1948_v12  ;;  %1967 = vpow2.f32 %v1590_v62  ;;  %v1017_v14 = vmul.f32 %v985_v8, %v2639_v22  ;;  %v1592_v20 = vmul.f32 -1.442695, %v2689_v16  ;;  %v2693_v21 = vpop.f32.mrb[17].mxu0  ;;  %1208 = vmatmul.mubr.f32.vlgmr.msra.gmra.mrb[32].mxu0 %v1015_v61 }
 0x19e   : > { %v1952_v5 = vpop.eup %1951  ;;  %v897_v23 = vadd.f32 1.0, %v1950_v17  ;;  %1969 = vpow2.f32 %v1591_v4  ;;  %v1018_v26 = vmul.f32 %v986_v13, %v2641_v24  ;;  %v1593_v7 = vmul.f32 -1.442695, %v2693_v21 }
 0x19f   : > { %v1954_v29 = vpop.eup %1953  ;;  %v987_v30 = vmul.f32 %v1952_v5, %v2623_v9  ;;  %1971 = vrcp.f32 %v896_v19 }
 0x1a0   : > { %v1956_v22 = vpop.eup %1955  ;;  %v988_v33 = vmul.f32 %v1954_v29, %v2626_v11  ;;  %1973 = vrcp.f32 %v897_v23  ;;  %v2703_v36 = vpop.f32.mrb[18].mxu0  ;;  %1213 = vmatprep.mubr.f32.mxu0 %v1018_v26 }
 0x1a1   : > { %v1958_v37 = vpop.eup %1957  ;;  %v898_v39 = vadd.f32 1.0, %v1956_v22  ;;  %1975 = vpow2.f32 %v1592_v20  ;;  %v1019_v24 = vmul.f32 %v987_v30, %v2649_v32  ;;  %v1594_v40 = vmul.f32 -1.442695, %v2703_v36  ;;  %v2707_v41 = vpop.f32.mrb[19].mxu0  ;;  %1214 = vmatmul.mubr.f32.gmra.mrb[34].mxu0 %v1017_v14 }
 0x1a2   : > { %v1960_v9 = vpop.eup %1959  ;;  %v899_v43 = vadd.f32 1.0, %v1958_v37  ;;  %1977 = vpow2.f32 %v1593_v7  ;;  %v1020_v46 = vmul.f32 %v988_v33, %v2651_v34  ;;  %v2710_v11 = vpop.f32.mrb[14].mxu1  ;;  %v1595_v50 = vmul.f32 -1.442695, %v2707_v41 }
 0x1a3   : > { %v1962_v47 = vpop.eup %1961  ;;  %v989_v49 = vmul.f32 %v1960_v9, %v2633_v15  ;;  %1979 = vrcp.f32 %v898_v39  ;;  %v2714_v51 = vpop.f32.mrb[15].mxu1 }
 0x1a4   : > { %1981 = vrcp.f32 %v899_v43  ;;  %v900_v32 = vadd.f32 1.0, %v1962_v47  ;;  %v2716_v53 = vpop.f32.mrb[20].mxu0  ;;  %1219 = vmatprep.mubr.f32.mxu0 %v1020_v46  ;;  %v2724_v61 = vpop.f32.mrb[16].mxu1 }
 0x1a5   : > { %v1964_v54 = vpop.eup %1963  ;;  %1983 = vpow2.f32 %v1594_v40  ;;  %v1021_v56 = vmul.f32 %v989_v49, %v2659_v42  ;;  %v1596_v34 = vmul.f32 -1.442695, %v2716_v53  ;;  %v2720_v57 = vpop.f32.mrb[21].mxu0  ;;  %1220 = vmatmul.mubr.f32.gmra.mrb[36].mxu0 %v1019_v24 }
 0x1a6   : > { %v1966_v15 = vpop.eup %1965  ;;  %v990_v59 = vmul.f32 %v1964_v54, %v2636_v18  ;;  %1985 = vrcp.f32 %v900_v32  ;;  %v1597_v60 = vmul.f32 -1.442695, %v2720_v57  ;;  %v2727_v1 = vpop.f32.mrb[17].mxu1 }
 0x1a7   : > { %v1968_v62 = vpop.eup %1967  ;;  %v991_v0 = vmul.f32 %v1966_v15, %v2643_v25  ;;  %1987 = vpow2.f32 %v1595_v50  ;;  %v2738_v20 = vpop.f32.mrb[18].mxu1 }
 0x1a8   : > { %v1970_v42 = vpop.eup %1969  ;;  %v901_v2 = vadd.f32 1.0, %v1968_v62  ;;  %1989 = vpow2.f32 %v1596_v34  ;;  %v1022_v4 = vmul.f32 %v990_v59, %v2661_v44  ;;  %v2730_v3 = vpop.f32.mrb[22].mxu0 }
 0x1a9   : > { %v1972_v8 = vpop.eup %1971  ;;  %v902_v18 = vadd.f32 1.0, %v1970_v42  ;;  %1991 = vpow2.f32 %v1597_v60  ;;  %v1023_v12 = vmul.f32 %v991_v0, %v2669_v52  ;;  %v1598_v13 = vmul.f32 -1.442695, %v2730_v3  ;;  %v2734_v17 = vpop.f32.mrb[23].mxu0 }
 0x1aa   : > { %v1974_v25 = vpop.eup %1973  ;;  %v992_v19 = vmul.f32 %v1972_v8, %v2646_v28  ;;  %1993 = vrcp.f32 %v901_v2  ;;  %1225 = vmatprep.mubr.f32.mxu0 %v1022_v4  ;;  %v1599_v14 = vmul.f32 -1.442695, %v2734_v17  ;;  %v2741_v23 = vpop.f32.mrb[19].mxu1 }
 0x1ab   : > { %v1976_v44 = vpop.eup %1975  ;;  %v993_v5 = vmul.f32 %v1974_v25, %v2653_v35  ;;  %1995 = vrcp.f32 %v902_v18  ;;  %1226 = vmatmul.mubr.f32.gmra.mrb[38].mxu0 %v1021_v56  ;;  %v2752_v40 = vpop.f32.mrb[20].mxu1 }
 0x1ac   : > { %v1978_v52 = vpop.eup %1977  ;;  %v903_v26 = vadd.f32 1.0, %v1976_v44  ;;  %1997 = vpow2.f32 %v1598_v13  ;;  %v1024_v7 = vmul.f32 %v992_v19, %v2672_v55  ;;  %v2744_v29 = vpop.f32.mrb[24].mxu0 }
 0x1ad   : > { %v1980_v28 = vpop.eup %1979  ;;  %v904_v30 = vadd.f32 1.0, %v1978_v52  ;;  %1999 = vpow2.f32 %v1599_v14  ;;  %v1025_v22 = vmul.f32 %v993_v5, %v2683_v6  ;;  %v1600_v33 = vmul.f32 -1.442695, %v2744_v29  ;;  %v2748_v37 = vpop.f32.mrb[25].mxu0 }
 0x1ae   : > { %v1982_v35 = vpop.eup %1981  ;;  %v994_v39 = vmul.f32 %v1980_v28, %v2656_v38  ;;  %2001 = vrcp.f32 %v903_v26  ;;  %1231 = vmatprep.mubr.f32.mxu0 %v1024_v7  ;;  %v1601_v24 = vmul.f32 -1.442695, %v2748_v37  ;;  %v2755_v43 = vpop.f32.mrb[21].mxu1 }
 0x1af   : > { %v1984_v55 = vpop.eup %1983  ;;  %v995_v9 = vmul.f32 %v1982_v35, %v2663_v45  ;;  %2003 = vrcp.f32 %v904_v30  ;;  %1232 = vmatmul.mubr.f32.gmra.mrb[40].mxu0 %v1023_v12  ;;  %v2765_v15 = vpop.f32.mrb[22].mxu1 }
 0x1b0   : > { %v1986_v6 = vpop.eup %1985  ;;  %v905_v46 = vadd.f32 1.0, %v1984_v55  ;;  %2005 = vpow2.f32 %v1600_v33  ;;  %v1026_v47 = vmul.f32 %v994_v39, %v2686_v10  ;;  %v2758_v49 = vpop.f32.mrb[26].mxu0 }
 0x1b1   : > { %v1988_v38 = vpop.eup %1987  ;;  %v996_v50 = vmul.f32 %v1986_v6, %v2666_v48  ;;  %2007 = vpow2.f32 %v1601_v24  ;;  %v1027_v32 = vmul.f32 %v995_v9, %v2697_v27  ;;  %v1602_v54 = vmul.f32 -1.442695, %v2758_v49  ;;  %v2763_v45 = vpop.f32.mrb[27].mxu0 }
 0x1b2   : > { %v1990_v56 = vpop.eup %1989  ;;  %2009 = vrcp.f32 %v905_v46  ;;  %v906_v34 = vadd.f32 1.0, %v1988_v38  ;;  %1237 = vmatprep.mubr.f32.mxu0 %v1026_v47  ;;  %v1603_v48 = vmul.f32 -1.442695, %v2763_v45  ;;  %v2769_v62 = vpop.f32.mrb[23].mxu1 }
 0x1b3   : > { %v1992_v59 = vpop.eup %1991  ;;  %v907_v10 = vadd.f32 1.0, %v1990_v56  ;;  %2011 = vpow2.f32 %v1602_v54  ;;  %v1028_v60 = vmul.f32 %v996_v50, %v2700_v31  ;;  %1238 = vmatmul.mubr.f32.gmra.mrb[42].mxu0 %v1025_v22  ;;  %v2778_v13 = vpop.f32.mrb[24].mxu1 }
 0x1b4   : > { %v1994_v27 = vpop.eup %1993  ;;  %2013 = vrcp.f32 %v906_v34  ;;  %v908_v0 = vadd.f32 1.0, %v1992_v59  ;;  %v2771_v42 = vpop.f32.mrb[28].mxu0 }
 0x1b5   : > { %v1996_v2 = vpop.eup %1995  ;;  %v997_v4 = vmul.f32 %v1994_v27, %v2675_v58  ;;  %2015 = vrcp.f32 %v907_v10  ;;  %v1604_v8 = vmul.f32 -1.442695, %v2771_v42  ;;  %1243 = vmatprep.mubr.f32.mxu0 %v1028_v60  ;;  %v2775_v18 = vpop.f32.mrb[29].mxu0 }
 0x1b6   : > { %v1998_v31 = vpop.eup %1997  ;;  %v998_v12 = vmul.f32 %v1996_v2, %v2679_v63  ;;  %2017 = vrcp.f32 %v908_v0  ;;  %v1605_v44 = vmul.f32 -1.442695, %v2775_v18  ;;  %v2782_v58 = vpop.f32.mrb[25].mxu1 }
 0x1b7   : > { %v2000_v25 = vpop.eup %1999  ;;  %v909_v19 = vadd.f32 1.0, %v1998_v31  ;;  %2019 = vpow2.f32 %v1603_v48  ;;  %v1029_v14 = vmul.f32 %v997_v4, %v2710_v11  ;;  %1244 = vmatmul.mubr.f32.gmra.mrb[44].mxu0 %v1027_v32  ;;  %v2792_v35 = vpop.f32.mrb[26].mxu1 }
 0x1b8   : > { %v2002_v5 = vpop.eup %2001  ;;  %v910_v52 = vadd.f32 1.0, %v2000_v25  ;;  %2021 = vpow2.f32 %v1604_v8  ;;  %v1030_v26 = vmul.f32 %v998_v12, %v2714_v51  ;;  %v2785_v7 = vpop.f32.mrb[30].mxu0 }
 0x1b9   : > { %v2004_v63 = vpop.eup %2003  ;;  %v999_v28 = vmul.f32 %v2002_v5, %v2689_v16  ;;  %2023 = vrcp.f32 %v909_v19  ;;  %v1606_v30 = vmul.f32 -1.442695, %v2785_v7  ;;  %v2789_v22 = vpop.f32.mrb[31].mxu0 }
 0x1ba   : > { %v2006_v11 = vpop.eup %2005  ;;  %v1000_v33 = vmul.f32 %v2004_v63, %v2693_v21  ;;  %2025 = vrcp.f32 %v910_v52  ;;  %1249 = vmatprep.mubr.f32.mxu0 %v1030_v26  ;;  %v1607_v55 = vmul.f32 -1.442695, %v2789_v22  ;;  %v2796_v16 = vpop.f32.mrb[27].mxu1 }
 0x1bb   : > { %v2008_v39 = vpop.eup %2007  ;;  %v911_v24 = vadd.f32 1.0, %v2006_v11  ;;  %2027 = vpow2.f32 %v1605_v44  ;;  %v1031_v51 = vmul.f32 %v999_v28, %v2724_v61  ;;  %1250 = vmatmul.mubr.f32.gmra.mrb[46].mxu0 %v1029_v14  ;;  %v780_v32 = vpop.f32.mrb[28].mxu1 }
 0x1bc   : > { %v2010_v9 = vpop.eup %2009  ;;  %v912_v6 = vadd.f32 1.0, %v2008_v39  ;;  %2029 = vpow2.f32 %v1606_v30  ;;  %v1032_v46 = vmul.f32 %v1000_v33, %v2727_v1  ;;  %v782_v34 = vpop.f32.mrb[29].mxu1 }
 0x1bd   : > { %v2012_v21 = vpop.eup %2011  ;;  %v1001_v47 = vmul.f32 %v2010_v9, %v2703_v36  ;;  %2031 = vrcp.f32 %v911_v24  ;;  %v786_v2 = vpop.f32.mrb[30].mxu1 }
 0x1be   : > { %v2014_v38 = vpop.eup %2013  ;;  %2033 = vrcp.f32 %v912_v6  ;;  %v913_v50 = vadd.f32 1.0, %v2012_v21  ;;  %1255 = vmatprep.mubr.f32.mxu1 %v1032_v46  ;;  %v788_v8 = vpop.f32.mrb[31].mxu1 }
 0x1bf   : > { %v2016_v61 = vpop.eup %2015  ;;  %v1002_v54 = vmul.f32 %v2014_v38, %v2707_v41  ;;  %2035 = vpow2.f32 %v1607_v55  ;;  %v1033_v56 = vmul.f32 %v1001_v47, %v2738_v20  ;;  %1256 = vmatmul.mubr.f32.vlgmr.msra.gmra.mrb[32].mxu1 %v1031_v51  ;;  %v1049_v47 = vld [vmem:[#allocation2 + $0x10] sm:$0xff] }
 0x1c0   : > { %v2018_v59 = vpop.eup %2017  ;;  %v1003_v1 = vmul.f32 %v2016_v61, %v2716_v53  ;;  %2037 = vrcp.f32 %v913_v50 }
 0x1c1   : > { %v2020_v10 = vpop.eup %2019  ;;  %v1004_v36 = vmul.f32 %v2018_v59, %v2720_v57  ;;  %v1034_v60 = vmul.f32 %v1002_v54, %v2741_v23  ;;  %v1052_v54 = vld [vmem:[#allocation2 + $0x28] sm:$0xff] }
 0x1c2   : > { %v2022_v48 = vpop.eup %2021  ;;  %v914_v27 = vadd.f32 1.0, %v2020_v10  ;;  %v1035_v0 = vmul.f32 %v1003_v1, %v2752_v40  ;;  %v1053_v10 = vld [vmem:[#allocation2 + $0x30] sm:$0xff] }
 0x1c3   : > { %v2024_v41 = vpop.eup %2023  ;;  %v915_v4 = vadd.f32 1.0, %v2022_v48  ;;  %v1036_v20 = vmul.f32 %v1004_v36, %v2755_v43  ;;  %1261 = vmatprep.mubr.f32.mxu1 %v1034_v60  ;;  %v1054_v36 = vld [vmem:[#allocation2 + $0x38] sm:$0xff] }
 0x1c4   : > { %v2026_v31 = vpop.eup %2025  ;;  %v1005_v53 = vmul.f32 %v2024_v41, %v2730_v3  ;;  %2039 = vrcp.f32 %v914_v27  ;;  %1262 = vmatmul.mubr.f32.gmra.mrb[34].mxu1 %v1033_v56  ;;  %v1056_v41 = vld [vmem:[#allocation2 + $0x48] sm:$0xff] }
 0x1c5   : > { %v2028_v12 = vpop.eup %2027  ;;  %v1006_v57 = vmul.f32 %v2026_v31, %v2734_v17  ;;  %2041 = vrcp.f32 %v915_v4  ;;  %1267 = vmatprep.mubr.f32.mxu1 %v1036_v20 }
 0x1c6   : > { %v2030_v23 = vpop.eup %2029  ;;  %v916_v25 = vadd.f32 1.0, %v2028_v12  ;;  %v1037_v40 = vmul.f32 %v1005_v53, %v2765_v15  ;;  %v1057_v53 = vld [vmem:[#allocation2 + $0x50] sm:$0xff]  ;;  %v1058_v12 = vld [vmem:[#allocation2 + $0x58] sm:$0xff] }
 0x1c7   : > { %v2032_v19 = vpop.eup %2031  ;;  %v917_v14 = vadd.f32 1.0, %v2030_v23  ;;  %v1038_v43 = vmul.f32 %v1006_v57, %v2769_v62 }
 0x1c8   : > { %v2034_v44 = vpop.eup %2033  ;;  %v1007_v5 = vmul.f32 %v2032_v19, %v2744_v29  ;;  %2043 = vrcp.f32 %v916_v25  ;;  %1268 = vmatmul.mubr.f32.gmra.mrb[36].mxu1 %v1035_v0  ;;  %v1059_v19 = vld [vmem:[#allocation2 + $0x60] sm:$0xff] }
 0x1c9   : > { %v2036_v3 = vpop.eup %2035  ;;  %v1008_v52 = vmul.f32 %v2034_v44, %v2748_v37  ;;  %2045 = vrcp.f32 %v917_v14  ;;  %1273 = vmatprep.mubr.f32.mxu1 %v1038_v43  ;;  %v1060_v14 = vld [vmem:[#allocation2 + $0x68] sm:$0xff] }
 0x1ca   : > { %v2038_v17 = vpop.eup %2037  ;;  %v918_v26 = vadd.f32 1.0, %v2036_v3  ;;  %v1039_v63 = vmul.f32 %v1007_v5, %v2778_v13 }
 0x1cb   : > { %v1009_v15 = vmul.f32 %v2038_v17, %v2758_v49  ;;  %v1040_v28 = vmul.f32 %v1008_v52, %v2782_v58  ;;  %v1061_v52 = vld [vmem:[#allocation2 + $0x70] sm:$0xff]  ;;  %v1062_v17 = vld [vmem:[#allocation2 + $0x78] sm:$0xff] }
 0x1cc   : > { %2047 = vrcp.f32 %v918_v26  ;;  %1274 = vmatmul.mubr.f32.gmra.mrb[38].mxu1 %v1037_v40 }
 0x1cd   : > { %v1041_v62 = vmul.f32 %v1009_v15, %v2792_v35  ;;  %1279 = vmatprep.mubr.f32.mxu1 %v1040_v28 }
 0x1ce   : > { %v2040_v29 = vpop.eup %2039 }
 0x1cf   : > { %v2042_v30 = vpop.eup %2041  ;;  %v1010_v11 = vmul.f32 %v2040_v29, %v2763_v45  ;;  %v1064_v29 = vld [vmem:[#allocation2 + $0x88] sm:$0xff] }
 0x1d0   : > { %v1011_v37 = vmul.f32 %v2042_v30, %v2771_v42  ;;  %1280 = vmatmul.mubr.f32.gmra.mrb[40].mxu1 %v1039_v63  ;;  %v1047_v42 = vld [vmem:[#allocation2] sm:$0xff] }
 0x1d1   : > { %v1042_v33 = vmul.f32 %v1010_v11, %v2796_v16  ;;  %v1048_v16 = vld [vmem:[#allocation2 + $0x8] sm:$0xff] }
 0x1d2   : > { %v2044_v39 = vpop.eup %2043  ;;  %v1043_v13 = vmul.f32 %v1011_v37, %v780_v32 }
 0x1d3   : > { %v2046_v24 = vpop.eup %2045  ;;  %v1012_v49 = vmul.f32 %v2044_v39, %v2775_v18  ;;  %1285 = vmatprep.mubr.f32.mxu1 %v1042_v33  ;;  %v1065_v39 = vld [vmem:[#allocation2 + $0x90] sm:$0xff] }
 0x1d4   : > { %v1013_v58 = vmul.f32 %v2046_v24, %v2785_v7  ;;  %1286 = vmatmul.mubr.f32.gmra.mrb[42].mxu1 %v1041_v62  ;;  %v1050_v7 = vld [vmem:[#allocation2 + $0x18] sm:$0xff]  ;;  %v1063_v62 = vld [vmem:[#allocation2 + $0x80] sm:$0xff] }
 0x1d5   : > { %v1044_v35 = vmul.f32 %v1012_v49, %v782_v34 }
 0x1d6   : > { %v2048_v51 = vpop.eup %2047  ;;  %v1045_v55 = vmul.f32 %v1013_v58, %v786_v2  ;;  %v1055_v2 = vld [vmem:[#allocation2 + $0x40] sm:$0xff] }
 0x1d7   : > { %v1014_v9 = vmul.f32 %v2048_v51, %v2789_v22  ;;  %1291 = vmatprep.mubr.f32.mxu1 %v1044_v35  ;;  %v1051_v22 = vld [vmem:[#allocation2 + $0x20] sm:$0xff] }
 0x1d8   : > { %1292 = vmatmul.mubr.f32.gmra.mrb[44].mxu1 %v1043_v13  ;;  %v1066_v13 = vld [vmem:[#allocation2 + $0x98] sm:$0xff]  ;;  %v1067_v51 = vld [vmem:[#allocation2 + $0xa0] sm:$0xff] }
 0x1d9   : > { %v1046_v45 = vmul.f32 %v1014_v9, %v788_v8 }
 0x1db   : > { %1297 = vmatprep.mubr.f32.mxu1 %v1046_v45 }
 0x1dc   : > { %1298 = vmatmul.mubr.f32.gmra.mrb[46].mxu1 %v1045_v55  ;;  %v1068_v55 = vld [vmem:[#allocation2 + $0xa8] sm:$0xff] }
 0x270   : > { %v1209_v6 = vpop.f32.mrb[32].mxu0 }
 0x271   : > { %v1304_v46 = vadd.f32 %v1209_v6, %v1047_v42  ;;  %v1211_v21 = vpop.f32.mrb[33].mxu0  ;;  %v1069_v6 = vld [vmem:[#allocation2 + $0xb0] sm:$0xff] }
 0x272   : > { %v1305_v18 = vadd.f32 %v1211_v21, %v1048_v16 }
 0x273   : > { %1336 = vst [vmem:[#allocation2] sm:$0xff] %v1304_v46  ;;  %v1070_v46 = vld [vmem:[#allocation2 + $0xb8] sm:$0xff] }
 0x274   : > { %1337 = vst [vmem:[#allocation2 + $0x8] sm:$0xff] %v1305_v18  ;;  %v1215_v38 = vpop.f32.mrb[34].mxu0 }
 0x275   : > { %v1306_v50 = vadd.f32 %v1215_v38, %v1049_v47  ;;  %v1217_v32 = vpop.f32.mrb[35].mxu0  ;;  %v1071_v38 = vld [vmem:[#allocation2 + $0xc0] sm:$0xff] }
 0x276   : > { %v1307_v61 = vadd.f32 %v1217_v32, %v1050_v7 }
 0x277   : > { %1338 = vst [vmem:[#allocation2 + $0x10] sm:$0xff] %v1306_v50  ;;  %v1072_v50 = vld [vmem:[#allocation2 + $0xc8] sm:$0xff] }
 0x278   : > { %1339 = vst [vmem:[#allocation2 + $0x18] sm:$0xff] %v1307_v61  ;;  %v1221_v56 = vpop.f32.mrb[36].mxu0 }
 0x279   : > { %v1308_v34 = vadd.f32 %v1221_v56, %v1051_v22  ;;  %v1223_v59 = vpop.f32.mrb[37].mxu0  ;;  %v1073_v56 = vld [vmem:[#allocation2 + $0xd0] sm:$0xff] }
 0x27a   : > { %v1309_v1 = vadd.f32 %v1223_v59, %v1052_v54 }
 0x27b   : > { %1340 = vst [vmem:[#allocation2 + $0x20] sm:$0xff] %v1308_v34  ;;  %v1074_v34 = vld [vmem:[#allocation2 + $0xd8] sm:$0xff] }
 0x27c   : > { %1341 = vst [vmem:[#allocation2 + $0x28] sm:$0xff] %v1309_v1 }
 0x27e   : > { %v1227_v60 = vpop.f32.mrb[38].mxu0 }
 0x27f   : > { %v1310_v48 = vadd.f32 %v1227_v60, %v1053_v10  ;;  %v1229_v27 = vpop.f32.mrb[39].mxu0  ;;  %v1075_v60 = vld [vmem:[#allocation2 + $0xe0] sm:$0xff] }
 0x280   : > { %v1311_v0 = vadd.f32 %v1229_v27, %v1054_v36 }
 0x281   : > { %1342 = vst [vmem:[#allocation2 + $0x30] sm:$0xff] %v1310_v48  ;;  %v1076_v48 = vld [vmem:[#allocation2 + $0xe8] sm:$0xff] }
 0x282   : > { %1343 = vst [vmem:[#allocation2 + $0x38] sm:$0xff] %v1311_v0  ;;  %v1233_v4 = vpop.f32.mrb[40].mxu0 }
 0x283   : > { %v1312_v20 = vadd.f32 %v1233_v4, %v1055_v2  ;;  %v1235_v8 = vpop.f32.mrb[41].mxu0  ;;  %v1077_v4 = vld [vmem:[#allocation2 + $0xf0] sm:$0xff] }
 0x284   : > { %v1313_v31 = vadd.f32 %v1235_v8, %v1056_v41 }
 0x285   : > { %1344 = vst [vmem:[#allocation2 + $0x40] sm:$0xff] %v1312_v20  ;;  %v1078_v20 = vld [vmem:[#allocation2 + $0xf8] sm:$0xff] }
 0x286   : > { %1345 = vst [vmem:[#allocation2 + $0x48] sm:$0xff] %v1313_v31  ;;  %v1239_v57 = vpop.f32.mrb[42].mxu0 }
 0x287   : > { %v1314_v23 = vadd.f32 %v1239_v57, %v1057_v53  ;;  %v1241_v25 = vpop.f32.mrb[43].mxu0  ;;  %v1372_v57 = vld [vmem:[#allocation2] sm:$0xff] (!%p1608_p5) }
 0x288   : > { %v1315_v40 = vadd.f32 %v1241_v25, %v1058_v12  ;;  %v1374_v25 = vld [vmem:[#allocation2 + $0x10] sm:$0xff] (!%p1608_p5)  ;;  %1404 = vst [vmem:[%s2384_s8] sm:$0xff] (!%p1608_p5), %v1372_v57 }
 0x289   : > { %1346 = vst [vmem:[#allocation2 + $0x50] sm:$0xff] %v1314_v23  ;;  %v1373_v23 = vld [vmem:[#allocation2 + $0x8] sm:$0xff] (!%p1608_p5)  ;;  %1406 = vst [vmem:[%s2384_s8 + $0x10] sm:$0xff] (!%p1608_p5), %v1374_v25 }
 0x28a   : > { %1347 = vst [vmem:[#allocation2 + $0x58] sm:$0xff] %v1315_v40  ;;  %v1245_v43 = vpop.f32.mrb[44].mxu0  ;;  %1405 = vst [vmem:[%s2384_s8 + $0x8] sm:$0xff] (!%p1608_p5), %v1373_v23  ;;  %v1375_v40 = vld [vmem:[#allocation2 + $0x18] sm:$0xff] (!%p1608_p5) }
 0x28b   : > { %v1316_v44 = vadd.f32 %v1245_v43, %v1059_v19  ;;  %v1247_v5 = vpop.f32.mrb[45].mxu0  ;;  %v1376_v19 = vld [vmem:[#allocation2 + $0x20] sm:$0xff] (!%p1608_p5)  ;;  %1407 = vst [vmem:[%s2384_s8 + $0x18] sm:$0xff] (!%p1608_p5), %v1375_v40  ;;  %v1378_v43 = vld [vmem:[#allocation2 + $0x30] sm:$0xff] (!%p1608_p5) }
 0x28c   : > { %v1317_v3 = vadd.f32 %v1247_v5, %v1060_v14  ;;  %v1377_v14 = vld [vmem:[#allocation2 + $0x28] sm:$0xff] (!%p1608_p5)  ;;  %1408 = vst [vmem:[%s2384_s8 + $0x20] sm:$0xff] (!%p1608_p5), %v1376_v19  ;;  %v1380_v5 = vld [vmem:[#allocation2 + $0x40] sm:$0xff] (!%p1608_p5)  ;;  %1410 = vst [vmem:[%s2384_s8 + $0x30] sm:$0xff] (!%p1608_p5), %v1378_v43 }
 0x28d   : > { %1348 = vst [vmem:[#allocation2 + $0x60] sm:$0xff] %v1316_v44  ;;  %1409 = vst [vmem:[%s2384_s8 + $0x28] sm:$0xff] (!%p1608_p5), %v1377_v14  ;;  %v1379_v44 = vld [vmem:[#allocation2 + $0x38] sm:$0xff] (!%p1608_p5) }
 0x28e   : > { %1349 = vst [vmem:[#allocation2 + $0x68] sm:$0xff] %v1317_v3  ;;  %v1251_v26 = vpop.f32.mrb[46].mxu0  ;;  %1411 = vst [vmem:[%s2384_s8 + $0x38] sm:$0xff] (!%p1608_p5), %v1379_v44  ;;  %v1381_v3 = vld [vmem:[#allocation2 + $0x48] sm:$0xff] (!%p1608_p5) }
 0x28f   : > { %v1318_v63 = vadd.f32 %v1251_v26, %v1061_v52  ;;  %v1253_v15 = vpop.f32.mrb[47].mxu0  ;;  %1412 = vst [vmem:[%s2384_s8 + $0x40] sm:$0xff] (!%p1608_p5), %v1380_v5  ;;  %1413 = vst [vmem:[%s2384_s8 + $0x48] sm:$0xff] (!%p1608_p5), %v1381_v3 }
 0x290   : > { %v1319_v28 = vadd.f32 %v1253_v15, %v1062_v17  ;;  %v1382_v52 = vld [vmem:[#allocation2 + $0x50] sm:$0xff] (!%p1608_p5) }
 0x291   : > { %1350 = vst [vmem:[#allocation2 + $0x70] sm:$0xff] %v1318_v63  ;;  %v1383_v17 = vld [vmem:[#allocation2 + $0x58] sm:$0xff] (!%p1608_p5)  ;;  %1414 = vst [vmem:[%s2384_s8 + $0x50] sm:$0xff] (!%p1608_p5), %v1382_v52 }
 0x292   : > { %1351 = vst [vmem:[#allocation2 + $0x78] sm:$0xff] %v1319_v28  ;;  %v1257_v30 = vpop.f32.mrb[32].mxu1  ;;  %1415 = vst [vmem:[%s2384_s8 + $0x58] sm:$0xff] (!%p1608_p5), %v1383_v17 }
 0x293   : > { %v1320_v11 = vadd.f32 %v1257_v30, %v1063_v62  ;;  %v1259_v37 = vpop.f32.mrb[33].mxu1 }
 0x294   : > { %v1321_v33 = vadd.f32 %v1259_v37, %v1064_v29  ;;  %v1384_v26 = vld [vmem:[#allocation2 + $0x60] sm:$0xff] (!%p1608_p5) }
 0x295   : > { %1352 = vst [vmem:[#allocation2 + $0x80] sm:$0xff] %v1320_v11  ;;  %v1385_v63 = vld [vmem:[#allocation2 + $0x68] sm:$0xff] (!%p1608_p5)  ;;  %1416 = vst [vmem:[%s2384_s8 + $0x60] sm:$0xff] (!%p1608_p5), %v1384_v26 }
 0x296   : > { %1353 = vst [vmem:[#allocation2 + $0x88] sm:$0xff] %v1321_v33  ;;  %1417 = vst [vmem:[%s2384_s8 + $0x68] sm:$0xff] (!%p1608_p5), %v1385_v63 }
 0x297   : > { %v1263_v24 = vpop.f32.mrb[34].mxu1 }
 0x298   : > { %v1322_v49 = vadd.f32 %v1263_v24, %v1065_v39  ;;  %v1265_v58 = vpop.f32.mrb[35].mxu1  ;;  %v1386_v15 = vld [vmem:[#allocation2 + $0x70] sm:$0xff] (!%p1608_p5) }
 0x299   : > { %v1323_v35 = vadd.f32 %v1265_v58, %v1066_v13  ;;  %1418 = vst [vmem:[%s2384_s8 + $0x70] sm:$0xff] (!%p1608_p5), %v1386_v15  ;;  %v1387_v28 = vld [vmem:[#allocation2 + $0x78] sm:$0xff] (!%p1608_p5) }
 0x29a   : > { %1354 = vst [vmem:[#allocation2 + $0x90] sm:$0xff] %v1322_v49  ;;  %1419 = vst [vmem:[%s2384_s8 + $0x78] sm:$0xff] (!%p1608_p5), %v1387_v28 }
 0x29b   : > { %1355 = vst [vmem:[#allocation2 + $0x98] sm:$0xff] %v1323_v35  ;;  %v1269_v9 = vpop.f32.mrb[36].mxu1 }
 0x29c   : > { %v1324_v45 = vadd.f32 %v1269_v9, %v1067_v51  ;;  %v1271_v42 = vpop.f32.mrb[37].mxu1  ;;  %v1388_v62 = vld [vmem:[#allocation2 + $0x80] sm:$0xff] (!%p1608_p5) }
 0x29d   : > { %v1325_v16 = vadd.f32 %v1271_v42, %v1068_v55  ;;  %v1389_v29 = vld [vmem:[#allocation2 + $0x88] sm:$0xff] (!%p1608_p5)  ;;  %1420 = vst [vmem:[%s2384_s8 + $0x80] sm:$0xff] (!%p1608_p5), %v1388_v62 }
 0x29e   : > { %1356 = vst [vmem:[#allocation2 + $0xa0] sm:$0xff] %v1324_v45  ;;  %1421 = vst [vmem:[%s2384_s8 + $0x88] sm:$0xff] (!%p1608_p5), %v1389_v29 }
 0x29f   : > { %1357 = vst [vmem:[#allocation2 + $0xa8] sm:$0xff] %v1325_v16  ;;  %v1275_v21 = vpop.f32.mrb[38].mxu1 }
 0x2a0   : > { %v1326_v18 = vadd.f32 %v1275_v21, %v1069_v6  ;;  %v1277_v47 = vpop.f32.mrb[39].mxu1 }
 0x2a1   : > { %v1327_v7 = vadd.f32 %v1277_v47, %v1070_v46  ;;  %v1390_v30 = vld [vmem:[#allocation2 + $0x90] sm:$0xff] (!%p1608_p5) }
 0x2a2   : > { %1358 = vst [vmem:[#allocation2 + $0xb0] sm:$0xff] %v1326_v18  ;;  %v1391_v11 = vld [vmem:[#allocation2 + $0x98] sm:$0xff] (!%p1608_p5)  ;;  %1422 = vst [vmem:[%s2384_s8 + $0x90] sm:$0xff] (!%p1608_p5), %v1390_v30 }
 0x2a3   : > { %1359 = vst [vmem:[#allocation2 + $0xb8] sm:$0xff] %v1327_v7  ;;  %v1281_v32 = vpop.f32.mrb[40].mxu1  ;;  %1423 = vst [vmem:[%s2384_s8 + $0x98] sm:$0xff] (!%p1608_p5), %v1391_v11 }
 0x2a4   : > { %v1328_v61 = vadd.f32 %v1281_v32, %v1071_v38  ;;  %v1283_v22 = vpop.f32.mrb[41].mxu1 }
 0x2a5   : > { %v1329_v54 = vadd.f32 %v1283_v22, %v1072_v50  ;;  %v1392_v37 = vld [vmem:[#allocation2 + $0xa0] sm:$0xff] (!%p1608_p5) }
 0x2a6   : > { %1360 = vst [vmem:[#allocation2 + $0xc0] sm:$0xff] %v1328_v61  ;;  %1424 = vst [vmem:[%s2384_s8 + $0xa0] sm:$0xff] (!%p1608_p5), %v1392_v37  ;;  %v1393_v33 = vld [vmem:[#allocation2 + $0xa8] sm:$0xff] (!%p1608_p5) }
 0x2a7   : > { %1361 = vst [vmem:[#allocation2 + $0xc8] sm:$0xff] %v1329_v54  ;;  %v1287_v59 = vpop.f32.mrb[42].mxu1  ;;  %1425 = vst [vmem:[%s2384_s8 + $0xa8] sm:$0xff] (!%p1608_p5), %v1393_v33 }
 0x2a8   : > { %v1330_v1 = vadd.f32 %v1287_v59, %v1073_v56  ;;  %v1289_v10 = vpop.f32.mrb[43].mxu1 }
 0x2a9   : > { %v1331_v36 = vadd.f32 %v1289_v10, %v1074_v34  ;;  %v1394_v39 = vld [vmem:[#allocation2 + $0xb0] sm:$0xff] (!%p1608_p5) }
 0x2aa   : > { %1362 = vst [vmem:[#allocation2 + $0xd0] sm:$0xff] %v1330_v1  ;;  %v1395_v13 = vld [vmem:[#allocation2 + $0xb8] sm:$0xff] (!%p1608_p5)  ;;  %1426 = vst [vmem:[%s2384_s8 + $0xb0] sm:$0xff] (!%p1608_p5), %v1394_v39 }
 0x2ab   : > { %1363 = vst [vmem:[#allocation2 + $0xd8] sm:$0xff] %v1331_v36  ;;  %v1293_v27 = vpop.f32.mrb[44].mxu1  ;;  %1427 = vst [vmem:[%s2384_s8 + $0xb8] sm:$0xff] (!%p1608_p5), %v1395_v13 }
 0x2ac   : > { %v1332_v0 = vadd.f32 %v1293_v27, %v1075_v60  ;;  %v1295_v2 = vpop.f32.mrb[45].mxu1 }
 0x2ad   : > { %v1333_v41 = vadd.f32 %v1295_v2, %v1076_v48  ;;  %1371 = sbr.rel (%p1608_p5) target bundleno = 700 (0x2bc), region = 48  ;;  %v1396_v24 = vld [vmem:[#allocation2 + $0xc0] sm:$0xff] (!%p1608_p5) }
 0x2ae   : > { %1364 = vst [vmem:[#allocation2 + $0xe0] sm:$0xff] %v1332_v0  ;;  %v1397_v49 = vld [vmem:[#allocation2 + $0xc8] sm:$0xff] (!%p1608_p5)  ;;  %1428 = vst [vmem:[%s2384_s8 + $0xc0] sm:$0xff] (!%p1608_p5), %v1396_v24 }
 0x2af   : > { %1365 = vst [vmem:[#allocation2 + $0xe8] sm:$0xff] %v1333_v41  ;;  %v1299_v8 = vpop.f32.mrb[46].mxu1  ;;  %1429 = vst [vmem:[%s2384_s8 + $0xc8] sm:$0xff] (!%p1608_p5), %v1397_v49 }
 0x2b0   : > { %v1334_v31 = vadd.f32 %v1299_v8, %v1077_v4  ;;  %v1301_v53 = vpop.f32.mrb[47].mxu1 }
 0x2b1   : > { %v1335_v12 = vadd.f32 %v1301_v53, %v1078_v20  ;;  %v1398_v58 = vld [vmem:[#allocation2 + $0xd0] sm:$0xff] (!%p1608_p5) }
 0x2b2   : > { %1366 = vst [vmem:[#allocation2 + $0xf0] sm:$0xff] %v1334_v31  ;;  %1430 = vst [vmem:[%s2384_s8 + $0xd0] sm:$0xff] (!%p1608_p5), %v1398_v58  ;;  %v1399_v35 = vld [vmem:[#allocation2 + $0xd8] sm:$0xff] (!%p1608_p5) }
 0x2b3   : > { %1367 = vst [vmem:[#allocation2 + $0xf8] sm:$0xff] %v1335_v12  ;;  %1431 = vst [vmem:[%s2384_s8 + $0xd8] sm:$0xff] (!%p1608_p5), %v1399_v35 }
 0x2b5   : > { %v1400_v51 = vld [vmem:[#allocation2 + $0xe0] sm:$0xff] }
 0x2b6   : > { %v1401_v55 = vld [vmem:[#allocation2 + $0xe8] sm:$0xff]  ;;  %1432 = vst [vmem:[%s2384_s8 + $0xe0] sm:$0xff] %v1400_v51 }
 0x2b7   : > { %1433 = vst [vmem:[%s2384_s8 + $0xe8] sm:$0xff] %v1401_v55 }
 0x2b9   : > { %v1402_v9 = vld [vmem:[#allocation2 + $0xf0] sm:$0xff] }
 0x2ba   : > { %v1403_v45 = vld [vmem:[#allocation2 + $0xf8] sm:$0xff]  ;;  %1434 = vst [vmem:[%s2384_s8 + $0xf0] sm:$0xff] %v1402_v9 }
 0x2bb   : > { %1435 = vst [vmem:[%s2384_s8 + $0xf8] sm:$0xff] %v1403_v45 }
 0x2bc PF: > { %s19_s19 = sadd.s32 1, %s2179_s19   ;;  %s2890_s12 = smov %s2155_s13 }
 0x2bd   : > { %p16_p8 = scmp.ge.s32.totalorder %s19_s19, 6   ;;  %s2891_s13 = smov %s2159_s14 }
 0x2be   : > { %s2892_s14 = smov %s2266_s26  ;;  %s2893_s15 = smov %s2171_s17 }
 0x2bf   : > { %s2894_s16 = smov %s2175_s18  ;;  %s2895_s17 = smov %s2898_s21 }
 0x2c0   : > { %s2896_s18 = smov %s2902_s22  ;;  %18 = sbr.rel (!%p16_p8) target bundleno = 7 (0x7), region = 96 }
 0x2c7   :  { %1460 = vsyncpa [#allocation4], 1 }
 0x2c8   :  { %1462 = vsyncpa [#allocation4 + $0x1], 1 }
 0x2c9   :  { %1463 = vsyncpa [#allocation6], 1 }
 0x2ca   :  { %1465 = vsyncpa [#allocation6 + $0x1], 1 }

</bundles_post_ra>
